<compile_context>
chip_gen: v5e
topology: v5e:2x2
jax: 0.10.0
libtpu: 0.0.40
codegen_flags: <defaults>
</compile_context>

<pallas_src>
import functools

import jax
import jax.numpy as jnp
from jax import lax
from jax.experimental import pallas as pl
from jax.experimental.pallas import tpu as pltpu


def _round_up(x, m):
    return ((x + m - 1) // m) * m


# --------------------------------------------------------------------------
# Pallas kernel 1: tiled dense  y = act(x @ w + b)
# bf16 operands, f32 VMEM accumulator, bias + optional GELU fused on last K,
# bf16 output (halves the output HBM write and feeds the next dense directly).
# --------------------------------------------------------------------------
def _dense_kernel(x_ref, w_ref, b_ref, o_ref, acc_ref, *, activation):
    k = pl.program_id(2)

    @pl.when(k == 0)
    def _():
        acc_ref[...] = jnp.zeros_like(acc_ref)

    acc_ref[...] += jnp.dot(x_ref[...], w_ref[...],
                            preferred_element_type=jnp.float32)

    @pl.when(k == pl.num_programs(2) - 1)
    def _():
        y = acc_ref[...] + b_ref[...]
        if activation == "gelu":
            y = jax.nn.gelu(y)
        o_ref[...] = y.astype(o_ref.dtype)


def dense_pallas(x, w, b, activation=None, out_dtype=jnp.bfloat16):
    """x: (M, K), w: (K, N) (ideally pre-cast bf16), b: (N,)/(1,N) -> (M, N)."""
    M, K = x.shape
    N = w.shape[1]

    # bf16 sublane packing wants M tiles in multiples of 16; 256 fills the
    # 256-wide MXU M dimension on v6e/v7x (2 native passes on v5e's 128 MXU).
    tm = min(256, _round_up(M, 16))
    tn = min(512, _round_up(N, 128))
    tk = min(512, _round_up(K, 128))
    Mp, Np, Kp = _round_up(M, tm), _round_up(N, tn), _round_up(K, tk)

    xb = x if x.dtype == jnp.bfloat16 else x.astype(jnp.bfloat16)
    wb = w if w.dtype == jnp.bfloat16 else w.astype(jnp.bfloat16)
    bb = b.reshape(1, -1)
    bb = bb if bb.dtype == jnp.float32 else bb.astype(jnp.float32)

    # No-ops when shapes are already tile-aligned (weights are aligned at init
    # so no per-call weight copies happen).
    if (Mp, Kp) != (M, K):
        xb = jnp.pad(xb, ((0, Mp - M), (0, Kp - K)))
    if (Kp, Np) != (K, N):
        wb = jnp.pad(wb, ((0, Kp - K), (0, Np - N)))
    if Np != N:
        bb = jnp.pad(bb, ((0, 0), (0, Np - N)))

    kern = functools.partial(_dense_kernel, activation=activation)
    out = pl.pallas_call(
        kern,
        out_shape=jax.ShapeDtypeStruct((Mp, Np), out_dtype),
        grid=(Mp // tm, Np // tn, Kp // tk),
        in_specs=[
            pl.BlockSpec((tm, tk), lambda i, j, k: (i, k)),
            pl.BlockSpec((tk, tn), lambda i, j, k: (k, j)),
            pl.BlockSpec((1, tn), lambda i, j, k: (0, j)),
        ],
        out_specs=pl.BlockSpec((tm, tn), lambda i, j, k: (i, j)),
        scratch_shapes=[pltpu.VMEM((tm, tn), jnp.float32)],
        compiler_params=pltpu.CompilerParams(
            dimension_semantics=("parallel", "parallel", "arbitrary")),
    )(xb, wb, bb)
    if (Mp, Np) != (M, N):
        out = out[:M, :N]
    return out


# --------------------------------------------------------------------------
# Pallas kernel 2: fused cloze scoring with vocab-tiled online LSE.
# Grid = (row_blocks, vocab_blocks); vocab is the inner "arbitrary" axis.
# Per (i, j):
#   logits = hidden_block @ emb_t_tile            (TM, TV) f32 acc, bf16 ops
#   picked += sum(where(col == tgt, logits, 0))   fused target gather
#   online max / sum-exp update for the LSE (f32 math on all generations)
# On the last vocab tile: out_row = mask * (picked - lse)   (or raw picked)
# --------------------------------------------------------------------------
def _cloze_kernel(tgt_ref, msk_ref, h_ref, embt_ref, out_ref,
                  m_ref, l_ref, p_ref, *, take_softmax, v_total, tv):
    j = pl.program_id(1)
    last = pl.num_programs(1) - 1

    @pl.when(j == 0)
    def _():
        m_ref[...] = jnp.full_like(m_ref, -jnp.inf)
        l_ref[...] = jnp.zeros_like(l_ref)
        p_ref[...] = jnp.zeros_like(p_ref)

    # (TM, H) bf16 @ (H, TV) bf16 -> (TM, TV) f32 on the MXU.  The embedding
    # is fed pre-transposed so no per-tile XLU transpose competes with the
    # cross-lane max/sum of the online LSE.
    logits = jnp.dot(h_ref[...], embt_ref[...],
                     preferred_element_type=jnp.float32)

    col = j * tv + lax.broadcasted_iota(jnp.int32, logits.shape, 1)

    # Fused target gather (targets are always < v_total so padded columns
    # never match; raw logits need no rescaling across vocab tiles).
    tgt = tgt_ref[...]                                        # (TM, 1) int32
    p_ref[...] += jnp.sum(jnp.where(col == tgt, logits, 0.0),
                          axis=-1, keepdims=True)

    if take_softmax:
        def lse_update(lg):
            m_new = jnp.maximum(m_ref[...], jnp.max(lg, axis=-1, keepdims=True))
            alpha = jnp.exp(m_ref[...] - m_new)
            l_ref[...] = alpha * l_ref[...] + jnp.sum(jnp.exp(lg - m_new),
                                                      axis=-1, keepdims=True)
            m_ref[...] = m_new

        if v_total % tv != 0:
            # Only the final vocab tile holds zero-padded columns; gate the
            # mask work so every other tile skips the compare+select.
            @pl.when(j != last)
            def _():
                lse_update(logits)

            @pl.when(j == last)
            def _():
                lse_update(jnp.where(col < v_total, logits, jnp.float32(-1e30)))
        else:
            lse_update(logits)

    @pl.when(j == last)
    def _():
        score = p_ref[...]
        if take_softmax:
            score = score - (m_ref[...] + jnp.log(l_ref[...]))
        out_ref[...] = score * msk_ref[...]


def choose_head_tv(V, H, vmem_budget=40 << 20):
    """Lane-aligned vocab tile, sized for the smallest-VMEM generation (v7x)."""
    tv = min(1024, _round_up(V, 128))
    # Double-buffered (H, tv) bf16 emb tile must stay well inside the budget.
    while tv > 128 and 2 * tv * H * 2 > vmem_budget // 2:
        tv = max(128, (tv // 2) // 128 * 128)
    return tv


def prepare_head_embedding(wte, tv):
    """One-time prep: transpose to (H, V), cast bf16, pad V to a tv multiple.

    Doing this once at init removes a full f32 read + bf16 write of the V*H
    table from every forward call and avoids an in-kernel transpose of each
    vocab tile."""
    V, H = wte.shape
    Vp = _round_up(V, tv)
    emb_t = wte.T.astype(jnp.bfloat16)
    if Vp != V:
        emb_t = jnp.pad(emb_t, ((0, 0), (0, Vp - V)))
    return emb_t


def cloze_score_pallas(hidden, emb_t, v_total, target_ids, logit_mask,
                       take_softmax=True, tv=None, vmem_budget=40 << 20):
    """hidden: (N, S, H); emb_t: (H, Vp) bf16 pre-transposed/padded;
    target_ids / logit_mask: (N, S) -> (N,) masked per-token score sums."""
    N, S, H = hidden.shape
    Vp = emb_t.shape[1]
    if tv is None:
        tv = choose_head_tv(v_total, H, vmem_budget)
    assert Vp % tv == 0, (Vp, tv)
    rows = N * S

    # Bigger row tiles raise arithmetic intensity: each extra row block
    # re-streams the whole (H, Vp) table from HBM.  TM goes up to 256
    # (v6e/v7x MXU M width) while keeping the double-buffered working set
    # (emb tile + hidden block + logits) inside the v7x 64 MiB VMEM budget.
    TM = min(256, _round_up(rows, 16))
    while TM > 16 and (2 * (tv * H * 2) + 2 * (TM * H * 2) + TM * tv * 4
                       > vmem_budget):
        TM //= 2
    TM = max(TM, 16)
    rows_p = _round_up(rows, TM)

    h2 = hidden.reshape(rows, H).astype(jnp.bfloat16)   # activations only
    tgt = target_ids.astype(jnp.int32).reshape(rows, 1)
    msk = logit_mask.astype(jnp.float32).reshape(rows, 1)
    if rows_p != rows:
        h2 = jnp.pad(h2, ((0, rows_p - rows), (0, 0)))
        tgt = jnp.pad(tgt, ((0, rows_p - rows), (0, 0)))
        msk = jnp.pad(msk, ((0, rows_p - rows), (0, 0)))

    kern = functools.partial(_cloze_kernel, take_softmax=take_softmax,
                             v_total=v_total, tv=tv)
    # TODO(synk): on v7x, when rows_p // TM == 1 the row axis gives no megacore
    # parallelism; splitting the vocab axis across the two TensorCores
    # (per-core partial m/l/p + tiny combine) would keep both MXUs busy
    # without re-streaming the embedding table.
    out = pl.pallas_call(
        kern,
        out_shape=jax.ShapeDtypeStruct((rows_p, 1), jnp.float32),
        grid=(rows_p // TM, Vp // tv),
        in_specs=[
            pl.BlockSpec((TM, 1), lambda i, j: (i, 0)),   # target ids
            pl.BlockSpec((TM, 1), lambda i, j: (i, 0)),   # logit mask
            pl.BlockSpec((TM, H), lambda i, j: (i, 0)),   # hidden row block
            pl.BlockSpec((H, tv), lambda i, j: (0, j)),   # pre-transposed emb
        ],
        out_specs=pl.BlockSpec((TM, 1), lambda i, j: (i, 0)),
        scratch_shapes=[pltpu.VMEM((TM, 1), jnp.float32)] * 3,  # m, l, picked
        compiler_params=pltpu.CompilerParams(
            dimension_semantics=("parallel", "arbitrary"),
            vmem_limit_bytes=min(vmem_budget + (8 << 20), 56 << 20)),
        cost_estimate=pl.CostEstimate(
            flops=2 * rows_p * H * Vp,
            transcendentals=rows_p * Vp,
            bytes_accessed=(rows_p // TM) * Vp * H * 2 + rows_p * H * 2
                           + rows_p * 12),
    )(tgt, msk, h2, emb_t)

    per_row = out[:rows, 0].reshape(N, S)     # masked per-token log-prob
    return per_row.sum(axis=1)                # (N,)


# --------------------------------------------------------------------------
# Synthetic single-layer GLM body (the injected `language_model`)
# --------------------------------------------------------------------------
def layer_norm(x, g, b, eps=1e-5):
    mu = jnp.mean(x, axis=-1, keepdims=True)
    var = jnp.mean((x - mu) ** 2, axis=-1, keepdims=True)
    return (x - mu) / jnp.sqrt(var + eps) * g + b


def glm_body(params, input_ids, position_ids, attention_mask):
    """input_ids, position_ids: (N, S) int; attention_mask: (N, S, S) -> (N, S, H)."""
    N, S = input_ids.shape
    H = params["wte"].shape[1]
    h = params["wte"][input_ids] + params["wpe"][position_ids]      # (N, S, H) f32

    # --- self-attention block (single head; softmax/LN left to XLA at S=8) ---
    x = layer_norm(h, params["ln1_g"], params["ln1_b"])
    qkv = dense_pallas(x.reshape(N * S, H), params["w_qkv"], params["b_qkv"])
    qkv = qkv.reshape(N, S, 3, H)
    q, k, v = qkv[:, :, 0], qkv[:, :, 1], qkv[:, :, 2]
    scores = jnp.einsum("nsh,nth->nst", q, k,
                        preferred_element_type=jnp.float32) / jnp.sqrt(jnp.float32(H))
    scores = jnp.where(attention_mask > 0, scores, jnp.float32(-1e9))
    probs = jax.nn.softmax(scores, axis=-1)
    ctx = jnp.einsum("nst,nth->nsh", probs, v.astype(jnp.float32),
                     preferred_element_type=jnp.float32)
    attn_out = dense_pallas(ctx.reshape(N * S, H), params["w_o"], params["b_o"])
    h = h + attn_out.reshape(N, S, H).astype(jnp.float32)

    # --- MLP block (bias + GELU fused inside the dense kernel; fc1 output is
    # bf16 and is consumed by fc2 without any re-cast) ---
    x = layer_norm(h, params["ln2_g"], params["ln2_b"])
    m = dense_pallas(x.reshape(N * S, H), params["w_fc1"], params["b_fc1"],
                     activation="gelu")
    m = dense_pallas(m, params["w_fc2"], params["b_fc2"])
    h = h + m.reshape(N, S, H).astype(jnp.float32)

    return layer_norm(h, params["lnf_g"], params["lnf_b"])


# --------------------------------------------------------------------------
# GLMForMultiTokenCloze.forward
# --------------------------------------------------------------------------
def glm_for_multi_token_cloze(params, input_ids, position_ids, attention_mask,
                              target_ids=None, logit_mask=None,
                              take_softmax=True, length_penalty=0.0,
                              head_tv=None):
    if target_ids is None:
        # LM-only path: return the synthetic body's hidden states.
        return glm_body(params, input_ids, position_ids, attention_mask)

    num_choices = None
    if input_ids.ndim == 3:
        _, num_choices = input_ids.shape[:2]
        input_ids = input_ids.reshape(-1, input_ids.shape[-1])
        attention_mask = attention_mask.reshape(-1, *attention_mask.shape[2:])
        position_ids = position_ids.reshape(-1, position_ids.shape[-1])
        target_ids = target_ids.reshape(-1, target_ids.shape[-1])
        logit_mask = logit_mask.reshape(-1, logit_mask.shape[-1])

    hidden = glm_body(params, input_ids, position_ids, attention_mask)   # (N, S, H)

    # Fused Pallas head: vocab matmul + online log_softmax + target gather
    # + masked per-token score; the embedding table is pre-cast/-transposed
    # once at init so the head streams it directly from HBM.
    logits = cloze_score_pallas(hidden, params["wte_head_t"],
                                params["wte"].shape[0],
                                target_ids, logit_mask,
                                take_softmax=take_softmax, tv=head_tv)    # (N,)

    if length_penalty > 0.0:
        # Guard against all-zero masks (undefined in the PyTorch original).
        denom = jnp.maximum(logit_mask.sum(axis=1).astype(jnp.float32), 1.0)
        logits = logits / denom ** length_penalty
    if num_choices is not None:
        logits = logits.reshape(-1, num_choices)
    # TODO(synk): transformer memory caches (*mems) and prompt_pos (prompt tuning)
    # are not modeled in the synthetic GLM body.
    return logits


# --------------------------------------------------------------------------
# Deterministic parameter init + one-time kernel-operand prep + demo
# --------------------------------------------------------------------------
def init_params(key, vocab, hidden, max_pos):
    ks = jax.random.split(key, 10)
    s = 0.02
    H = hidden
    return {
        "wte": jax.random.normal(ks[0], (vocab, H), jnp.float32) * s,
        "wpe": jax.random.normal(ks[1], (max_pos, H), jnp.float32) * s,
        "ln1_g": jnp.ones((H,), jnp.float32), "ln1_b": jnp.zeros((H,), jnp.float32),
        "w_qkv": jax.random.normal(ks[2], (H, 3 * H), jnp.float32) * s,
        "b_qkv": jax.random.normal(ks[3], (1, 3 * H), jnp.float32) * s,
        "w_o": jax.random.normal(ks[4], (H, H), jnp.float32) * s,
        "b_o": jax.random.normal(ks[5], (1, H), jnp.float32) * s,
        "ln2_g": jnp.ones((H,), jnp.float32), "ln2_b": jnp.zeros((H,), jnp.float32),
        "w_fc1": jax.random.normal(ks[6], (H, 4 * H), jnp.float32) * s,
        "b_fc1": jax.random.normal(ks[7], (1, 4 * H), jnp.float32) * s,
        "w_fc2": jax.random.normal(ks[8], (4 * H, H), jnp.float32) * s,
        "b_fc2": jax.random.normal(ks[9], (1, H), jnp.float32) * s,
        "lnf_g": jnp.ones((H,), jnp.float32), "lnf_b": jnp.zeros((H,), jnp.float32),
    }


def prepare_kernel_params(params, head_tv=None):
    """One-time prep of kernel-side operands (runs once, NOT per forward):
      * projection weights pre-cast to bf16 (the matmul operand dtype),
      * output embedding pre-transposed / bf16 / vocab-padded for the head.
    The f32 `wte` master is kept for the body's embedding lookup."""
    V, H = params["wte"].shape
    if head_tv is None:
        head_tv = choose_head_tv(V, H)
    p = dict(params)
    for name in ("w_qkv", "w_o", "w_fc1", "w_fc2"):
        p[name] = params[name].astype(jnp.bfloat16)
    p["wte_head_t"] = prepare_head_embedding(params["wte"], head_tv)
    return p, head_tv


if __name__ == "__main__":
    # batch, num_choices, seq, hidden (multiple of 128 -> full lanes), vocab
    B, C, S, H, V = 2, 2, 8, 128, 448
    MAX_POS = 16
    HEAD_TV = 128   # small demo: 4 vocab tiles, last one with 64 padded columns

    key = jax.random.PRNGKey(0)
    kp, ki, kt, km = jax.random.split(key, 4)
    params = init_params(kp, V, H, MAX_POS)
    kparams, head_tv = prepare_kernel_params(params, head_tv=HEAD_TV)

    input_ids = jax.random.randint(ki, (B, C, S), 0, V, dtype=jnp.int32)
    position_ids = jnp.broadcast_to(jnp.arange(S, dtype=jnp.int32), (B, C, S))
    causal = jnp.tril(jnp.ones((S, S), jnp.float32))
    attention_mask = jnp.broadcast_to(causal, (B, C, S, S))
    target_ids = jax.random.randint(kt, (B, C, S), 0, V, dtype=jnp.int32)
    logit_mask = (jax.random.uniform(km, (B, C, S)) > 0.3).astype(jnp.float32)

    fwd = jax.jit(functools.partial(glm_for_multi_token_cloze,
                                    take_softmax=True, length_penalty=0.0,
                                    head_tv=head_tv))
    out = jax.block_until_ready(
        fwd(kparams, input_ids, position_ids, attention_mask,
            target_ids, logit_mask))
    assert out.shape == (B, C), out.shape

    # Reference check of the cloze head (plain-JAX log_softmax + gather +
    # masked sum, same bf16-operand / f32-accumulate matmul precision).
    hidden_ref = glm_body(
        kparams,
        input_ids.reshape(-1, S),
        position_ids.reshape(-1, S),
        attention_mask.reshape(-1, S, S),
    )
    full_logits = jnp.einsum("nsh,vh->nsv",
                             hidden_ref.astype(jnp.bfloat16),
                             params["wte"].astype(jnp.bfloat16),
                             preferred_element_type=jnp.float32)
    logp = jax.nn.log_softmax(full_logits, axis=-1)
    gathered = jnp.take_along_axis(
        logp, target_ids.reshape(-1, S)[..., None], axis=-1)[..., 0]
    ref = (gathered * logit_mask.reshape(-1, S)).sum(axis=1).reshape(B, C)

    assert jnp.allclose(out, ref, atol=5e-2, rtol=5e-3), (out, ref)
    print("KERNEL_OK")
</pallas_src>

<mosaic_0001>
module attributes {stable_mosaic.version = 11 : i64} {
  func.func @_dense_kernel(%arg0: i32, %arg1: i32, %arg2: i32, %arg3: memref<32x128xbf16, #tpu.memory_space<vmem>>, %arg4: memref<128x384xbf16, #tpu.memory_space<vmem>>, %arg5: memref<1x384xf32, #tpu.memory_space<vmem>>, %arg6: memref<32x384xbf16, #tpu.memory_space<vmem>>, %arg7: memref<32x384xf32, #tpu.memory_space<vmem>>) attributes {dimension_semantics = [#tpu.dimension_semantics<parallel>, #tpu.dimension_semantics<parallel>, #tpu.dimension_semantics<arbitrary>], iteration_bounds = array<i64: 1, 1, 1>, scalar_prefetch = 0 : i64, scratch_operands = 1 : i64, tpu.core_type = #tpu.core_type<tc>, window_params = [{transform_indices = @transform_0, window_bounds = array<i64: 32, 128>}, {transform_indices = @transform_1, window_bounds = array<i64: 128, 384>}, {transform_indices = @transform_2, window_bounds = array<i64: 1, 384>}, {transform_indices = @transform_3, window_bounds = array<i64: 32, 384>}]} {
    %c0_i32 = arith.constant 0 : i32
    %0 = arith.cmpi eq, %arg2, %c0_i32 : i32
    %1 = arith.extui %0 : i1 to i32
    %c0_i32_0 = arith.constant 0 : i32
    %2 = arith.cmpi ne, %1, %c0_i32_0 : i32
    scf.if %2 {
      %cst_10 = arith.constant 0.000000e+00 : f32
      %12 = vector.broadcast %cst_10 : f32 to vector<32x384xf32>
      %c0_11 = arith.constant 0 : index
      %c0_12 = arith.constant 0 : index
      %13 = vector.load %arg7[%c0_11, %c0_12] : memref<32x384xf32, #tpu.memory_space<vmem>>, vector<32x384xf32>
      tpu.vector_store %arg7[%c0_11, %c0_12], %12 {strides = array<i32>} : memref<32x384xf32, #tpu.memory_space<vmem>>, vector<32x384xf32>,
    } else {
    }
    %c0 = arith.constant 0 : index
    %c0_1 = arith.constant 0 : index
    %3 = vector.load %arg7[%c0, %c0_1] : memref<32x384xf32, #tpu.memory_space<vmem>>, vector<32x384xf32>
    %c0_2 = arith.constant 0 : index
    %c0_3 = arith.constant 0 : index
    %4 = vector.load %arg3[%c0_2, %c0_3] : memref<32x128xbf16, #tpu.memory_space<vmem>>, vector<32x128xbf16>
    %c0_4 = arith.constant 0 : index
    %c0_5 = arith.constant 0 : index
    %5 = vector.load %arg4[%c0_4, %c0_5] : memref<128x384xbf16, #tpu.memory_space<vmem>>, vector<128x384xbf16>
    %cst = arith.constant dense<0.000000e+00> : vector<32x384xf32>
    %6 = tpu.matmul %4, %5, %cst {dimension_numbers = #tpu.dot_dimension_numbers<[1], [0], [0], [1], [0, 0, 1, 1], [], []>} : vector<32x128xbf16>, vector<128x384xbf16>, vector<32x384xf32> -> vector<32x384xf32>
    %7 = arith.addf %3, %6 : vector<32x384xf32>
    %c0_6 = arith.constant 0 : index
    %c0_7 = arith.constant 0 : index
    %8 = vector.load %arg7[%c0_6, %c0_7] : memref<32x384xf32, #tpu.memory_space<vmem>>, vector<32x384xf32>
    tpu.vector_store %arg7[%c0_6, %c0_7], %7 {strides = array<i32>} : memref<32x384xf32, #tpu.memory_space<vmem>>, vector<32x384xf32>,
    %c0_i32_8 = arith.constant 0 : i32
    %9 = arith.cmpi eq, %arg2, %c0_i32_8 : i32
    %10 = arith.extui %9 : i1 to i32
    %c0_i32_9 = arith.constant 0 : i32
    %11 = arith.cmpi ne, %10, %c0_i32_9 : i32
    scf.if %11 {
      %c0_10 = arith.constant 0 : index
      %c0_11 = arith.constant 0 : index
      %12 = vector.load %arg7[%c0_10, %c0_11] : memref<32x384xf32, #tpu.memory_space<vmem>>, vector<32x384xf32>
      %c0_12 = arith.constant 0 : index
      %c0_13 = arith.constant 0 : index
      %13 = vector.load %arg5[%c0_12, %c0_13] : memref<1x384xf32, #tpu.memory_space<vmem>>, vector<1x384xf32>
      %14 = vector.broadcast %13 : vector<1x384xf32> to vector<32x384xf32>
      %15 = arith.addf %12, %14 : vector<32x384xf32>
      %16 = arith.truncf %15 : vector<32x384xf32> to vector<32x384xbf16>
      %c0_14 = arith.constant 0 : index
      %c0_15 = arith.constant 0 : index
      %17 = vector.load %arg6[%c0_14, %c0_15] : memref<32x384xbf16, #tpu.memory_space<vmem>>, vector<32x384xbf16>
      tpu.vector_store %arg6[%c0_14, %c0_15], %16 {strides = array<i32>} : memref<32x384xbf16, #tpu.memory_space<vmem>>, vector<32x384xbf16>,
    } else {
    }
    return
  }
  func.func @transform_0(%arg0: i32, %arg1: i32, %arg2: i32) -> (i32, i32) {
    %c0_i32 = arith.constant 0 : i32
    return %arg0, %arg2 : i32, i32
  }
  func.func @transform_1(%arg0: i32, %arg1: i32, %arg2: i32) -> (i32, i32) {
    %c0_i32 = arith.constant 0 : i32
    return %arg2, %arg1 : i32, i32
  }
  func.func @transform_2(%arg0: i32, %arg1: i32, %arg2: i32) -> (i32, i32) {
    %c0_i32 = arith.constant 0 : i32
    %c0_i32_0 = arith.constant 0 : i32
    return %c0_i32, %arg1 : i32, i32
  }
  func.func @transform_3(%arg0: i32, %arg1: i32, %arg2: i32) -> (i32, i32) {
    %c0_i32 = arith.constant 0 : i32
    return %arg0, %arg1 : i32, i32
  }
}

module attributes {stable_mosaic.version = 11 : i64} {
  func.func @_dense_kernel(%arg0: i32, %arg1: i32, %arg2: i32, %arg3: memref<32x128xbf16, #tpu.memory_space<vmem>>, %arg4: memref<128x128xbf16, #tpu.memory_space<vmem>>, %arg5: memref<1x128xf32, #tpu.memory_space<vmem>>, %arg6: memref<32x128xbf16, #tpu.memory_space<vmem>>, %arg7: memref<32x128xf32, #tpu.memory_space<vmem>>) attributes {dimension_semantics = [#tpu.dimension_semantics<parallel>, #tpu.dimension_semantics<parallel>, #tpu.dimension_semantics<arbitrary>], iteration_bounds = array<i64: 1, 1, 1>, scalar_prefetch = 0 : i64, scratch_operands = 1 : i64, tpu.core_type = #tpu.core_type<tc>, window_params = [{transform_indices = @transform_0, window_bounds = array<i64: 32, 128>}, {transform_indices = @transform_1, window_bounds = array<i64: 128, 128>}, {transform_indices = @transform_2, window_bounds = array<i64: 1, 128>}, {transform_indices = @transform_3, window_bounds = array<i64: 32, 128>}]} {
    %c0_i32 = arith.constant 0 : i32
    %0 = arith.cmpi eq, %arg2, %c0_i32 : i32
    %1 = arith.extui %0 : i1 to i32
    %c0_i32_0 = arith.constant 0 : i32
    %2 = arith.cmpi ne, %1, %c0_i32_0 : i32
    scf.if %2 {
      %cst_10 = arith.constant 0.000000e+00 : f32
      %12 = vector.broadcast %cst_10 : f32 to vector<32x128xf32>
      %c0_11 = arith.constant 0 : index
      %c0_12 = arith.constant 0 : index
      %13 = vector.load %arg7[%c0_11, %c0_12] : memref<32x128xf32, #tpu.memory_space<vmem>>, vector<32x128xf32>
      tpu.vector_store %arg7[%c0_11, %c0_12], %12 {strides = array<i32>} : memref<32x128xf32, #tpu.memory_space<vmem>>, vector<32x128xf32>,
    } else {
    }
    %c0 = arith.constant 0 : index
    %c0_1 = arith.constant 0 : index
    %3 = vector.load %arg7[%c0, %c0_1] : memref<32x128xf32, #tpu.memory_space<vmem>>, vector<32x128xf32>
    %c0_2 = arith.constant 0 : index
    %c0_3 = arith.constant 0 : index
    %4 = vector.load %arg3[%c0_2, %c0_3] : memref<32x128xbf16, #tpu.memory_space<vmem>>, vector<32x128xbf16>
    %c0_4 = arith.constant 0 : index
    %c0_5 = arith.constant 0 : index
    %5 = vector.load %arg4[%c0_4, %c0_5] : memref<128x128xbf16, #tpu.memory_space<vmem>>, vector<128x128xbf16>
    %cst = arith.constant dense<0.000000e+00> : vector<32x128xf32>
    %6 = tpu.matmul %4, %5, %cst {dimension_numbers = #tpu.dot_dimension_numbers<[1], [0], [0], [1], [0, 0, 1, 1], [], []>} : vector<32x128xbf16>, vector<128x128xbf16>, vector<32x128xf32> -> vector<32x128xf32>
    %7 = arith.addf %3, %6 : vector<32x128xf32>
    %c0_6 = arith.constant 0 : index
    %c0_7 = arith.constant 0 : index
    %8 = vector.load %arg7[%c0_6, %c0_7] : memref<32x128xf32, #tpu.memory_space<vmem>>, vector<32x128xf32>
    tpu.vector_store %arg7[%c0_6, %c0_7], %7 {strides = array<i32>} : memref<32x128xf32, #tpu.memory_space<vmem>>, vector<32x128xf32>,
    %c0_i32_8 = arith.constant 0 : i32
    %9 = arith.cmpi eq, %arg2, %c0_i32_8 : i32
    %10 = arith.extui %9 : i1 to i32
    %c0_i32_9 = arith.constant 0 : i32
    %11 = arith.cmpi ne, %10, %c0_i32_9 : i32
    scf.if %11 {
      %c0_10 = arith.constant 0 : index
      %c0_11 = arith.constant 0 : index
      %12 = vector.load %arg7[%c0_10, %c0_11] : memref<32x128xf32, #tpu.memory_space<vmem>>, vector<32x128xf32>
      %c0_12 = arith.constant 0 : index
      %c0_13 = arith.constant 0 : index
      %13 = vector.load %arg5[%c0_12, %c0_13] : memref<1x128xf32, #tpu.memory_space<vmem>>, vector<1x128xf32>
      %14 = vector.broadcast %13 : vector<1x128xf32> to vector<32x128xf32>
      %15 = arith.addf %12, %14 : vector<32x128xf32>
      %16 = arith.truncf %15 : vector<32x128xf32> to vector<32x128xbf16>
      %c0_14 = arith.constant 0 : index
      %c0_15 = arith.constant 0 : index
      %17 = vector.load %arg6[%c0_14, %c0_15] : memref<32x128xbf16, #tpu.memory_space<vmem>>, vector<32x128xbf16>
      tpu.vector_store %arg6[%c0_14, %c0_15], %16 {strides = array<i32>} : memref<32x128xbf16, #tpu.memory_space<vmem>>, vector<32x128xbf16>,
    } else {
    }
    return
  }
  func.func @transform_0(%arg0: i32, %arg1: i32, %arg2: i32) -> (i32, i32) {
    %c0_i32 = arith.constant 0 : i32
    return %arg0, %arg2 : i32, i32
  }
  func.func @transform_1(%arg0: i32, %arg1: i32, %arg2: i32) -> (i32, i32) {
    %c0_i32 = arith.constant 0 : i32
    return %arg2, %arg1 : i32, i32
  }
  func.func @transform_2(%arg0: i32, %arg1: i32, %arg2: i32) -> (i32, i32) {
    %c0_i32 = arith.constant 0 : i32
    %c0_i32_0 = arith.constant 0 : i32
    return %c0_i32, %arg1 : i32, i32
  }
  func.func @transform_3(%arg0: i32, %arg1: i32, %arg2: i32) -> (i32, i32) {
    %c0_i32 = arith.constant 0 : i32
    return %arg0, %arg1 : i32, i32
  }
}

module attributes {stable_mosaic.version = 11 : i64} {
  func.func @_dense_kernel(%arg0: i32, %arg1: i32, %arg2: i32, %arg3: memref<32x128xbf16, #tpu.memory_space<vmem>>, %arg4: memref<128x512xbf16, #tpu.memory_space<vmem>>, %arg5: memref<1x512xf32, #tpu.memory_space<vmem>>, %arg6: memref<32x512xbf16, #tpu.memory_space<vmem>>, %arg7: memref<32x512xf32, #tpu.memory_space<vmem>>) attributes {dimension_semantics = [#tpu.dimension_semantics<parallel>, #tpu.dimension_semantics<parallel>, #tpu.dimension_semantics<arbitrary>], iteration_bounds = array<i64: 1, 1, 1>, scalar_prefetch = 0 : i64, scratch_operands = 1 : i64, tpu.core_type = #tpu.core_type<tc>, window_params = [{transform_indices = @transform_0, window_bounds = array<i64: 32, 128>}, {transform_indices = @transform_1, window_bounds = array<i64: 128, 512>}, {transform_indices = @transform_2, window_bounds = array<i64: 1, 512>}, {transform_indices = @transform_3, window_bounds = array<i64: 32, 512>}]} {
    %c0_i32 = arith.constant 0 : i32
    %0 = arith.cmpi eq, %arg2, %c0_i32 : i32
    %1 = arith.extui %0 : i1 to i32
    %c0_i32_0 = arith.constant 0 : i32
    %2 = arith.cmpi ne, %1, %c0_i32_0 : i32
    scf.if %2 {
      %cst_10 = arith.constant 0.000000e+00 : f32
      %12 = vector.broadcast %cst_10 : f32 to vector<32x512xf32>
      %c0_11 = arith.constant 0 : index
      %c0_12 = arith.constant 0 : index
      %13 = vector.load %arg7[%c0_11, %c0_12] : memref<32x512xf32, #tpu.memory_space<vmem>>, vector<32x512xf32>
      tpu.vector_store %arg7[%c0_11, %c0_12], %12 {strides = array<i32>} : memref<32x512xf32, #tpu.memory_space<vmem>>, vector<32x512xf32>,
    } else {
    }
    %c0 = arith.constant 0 : index
    %c0_1 = arith.constant 0 : index
    %3 = vector.load %arg7[%c0, %c0_1] : memref<32x512xf32, #tpu.memory_space<vmem>>, vector<32x512xf32>
    %c0_2 = arith.constant 0 : index
    %c0_3 = arith.constant 0 : index
    %4 = vector.load %arg3[%c0_2, %c0_3] : memref<32x128xbf16, #tpu.memory_space<vmem>>, vector<32x128xbf16>
    %c0_4 = arith.constant 0 : index
    %c0_5 = arith.constant 0 : index
    %5 = vector.load %arg4[%c0_4, %c0_5] : memref<128x512xbf16, #tpu.memory_space<vmem>>, vector<128x512xbf16>
    %cst = arith.constant dense<0.000000e+00> : vector<32x512xf32>
    %6 = tpu.matmul %4, %5, %cst {dimension_numbers = #tpu.dot_dimension_numbers<[1], [0], [0], [1], [0, 0, 1, 1], [], []>} : vector<32x128xbf16>, vector<128x512xbf16>, vector<32x512xf32> -> vector<32x512xf32>
    %7 = arith.addf %3, %6 : vector<32x512xf32>
    %c0_6 = arith.constant 0 : index
    %c0_7 = arith.constant 0 : index
    %8 = vector.load %arg7[%c0_6, %c0_7] : memref<32x512xf32, #tpu.memory_space<vmem>>, vector<32x512xf32>
    tpu.vector_store %arg7[%c0_6, %c0_7], %7 {strides = array<i32>} : memref<32x512xf32, #tpu.memory_space<vmem>>, vector<32x512xf32>,
    %c0_i32_8 = arith.constant 0 : i32
    %9 = arith.cmpi eq, %arg2, %c0_i32_8 : i32
    %10 = arith.extui %9 : i1 to i32
    %c0_i32_9 = arith.constant 0 : i32
    %11 = arith.cmpi ne, %10, %c0_i32_9 : i32
    scf.if %11 {
      %c0_10 = arith.constant 0 : index
      %c0_11 = arith.constant 0 : index
      %12 = vector.load %arg7[%c0_10, %c0_11] : memref<32x512xf32, #tpu.memory_space<vmem>>, vector<32x512xf32>
      %c0_12 = arith.constant 0 : index
      %c0_13 = arith.constant 0 : index
      %13 = vector.load %arg5[%c0_12, %c0_13] : memref<1x512xf32, #tpu.memory_space<vmem>>, vector<1x512xf32>
      %14 = vector.broadcast %13 : vector<1x512xf32> to vector<32x512xf32>
      %15 = arith.addf %12, %14 : vector<32x512xf32>
      %16 = arith.mulf %15, %15 : vector<32x512xf32>
      %17 = arith.mulf %15, %16 : vector<32x512xf32>
      %cst_14 = arith.constant 4.471500e-02 : f32
      %18 = vector.broadcast %cst_14 : f32 to vector<32x512xf32>
      %19 = arith.mulf %18, %17 : vector<32x512xf32>
      %20 = arith.addf %15, %19 : vector<32x512xf32>
      %cst_15 = arith.constant 0.797884583 : f32
      %21 = vector.broadcast %cst_15 : f32 to vector<32x512xf32>
      %22 = arith.mulf %21, %20 : vector<32x512xf32>
      %23 = math.tanh %22 : vector<32x512xf32>
      %cst_16 = arith.constant 1.000000e+00 : f32
      %24 = vector.broadcast %cst_16 : f32 to vector<32x512xf32>
      %25 = arith.addf %24, %23 : vector<32x512xf32>
      %cst_17 = arith.constant 5.000000e-01 : f32
      %26 = vector.broadcast %cst_17 : f32 to vector<32x512xf32>
      %27 = arith.mulf %26, %25 : vector<32x512xf32>
      %28 = arith.mulf %15, %27 : vector<32x512xf32>
      %29 = arith.truncf %28 : vector<32x512xf32> to vector<32x512xbf16>
      %c0_18 = arith.constant 0 : index
      %c0_19 = arith.constant 0 : index
      %30 = vector.load %arg6[%c0_18, %c0_19] : memref<32x512xbf16, #tpu.memory_space<vmem>>, vector<32x512xbf16>
      tpu.vector_store %arg6[%c0_18, %c0_19], %29 {strides = array<i32>} : memref<32x512xbf16, #tpu.memory_space<vmem>>, vector<32x512xbf16>,
    } else {
    }
    return
  }
  func.func @transform_0(%arg0: i32, %arg1: i32, %arg2: i32) -> (i32, i32) {
    %c0_i32 = arith.constant 0 : i32
    return %arg0, %arg2 : i32, i32
  }
  func.func @transform_1(%arg0: i32, %arg1: i32, %arg2: i32) -> (i32, i32) {
    %c0_i32 = arith.constant 0 : i32
    return %arg2, %arg1 : i32, i32
  }
  func.func @transform_2(%arg0: i32, %arg1: i32, %arg2: i32) -> (i32, i32) {
    %c0_i32 = arith.constant 0 : i32
    %c0_i32_0 = arith.constant 0 : i32
    return %c0_i32, %arg1 : i32, i32
  }
  func.func @transform_3(%arg0: i32, %arg1: i32, %arg2: i32) -> (i32, i32) {
    %c0_i32 = arith.constant 0 : i32
    return %arg0, %arg1 : i32, i32
  }
}

module attributes {stable_mosaic.version = 11 : i64} {
  func.func @_dense_kernel(%arg0: i32, %arg1: i32, %arg2: i32, %arg3: memref<32x512xbf16, #tpu.memory_space<vmem>>, %arg4: memref<512x128xbf16, #tpu.memory_space<vmem>>, %arg5: memref<1x128xf32, #tpu.memory_space<vmem>>, %arg6: memref<32x128xbf16, #tpu.memory_space<vmem>>, %arg7: memref<32x128xf32, #tpu.memory_space<vmem>>) attributes {dimension_semantics = [#tpu.dimension_semantics<parallel>, #tpu.dimension_semantics<parallel>, #tpu.dimension_semantics<arbitrary>], iteration_bounds = array<i64: 1, 1, 1>, scalar_prefetch = 0 : i64, scratch_operands = 1 : i64, tpu.core_type = #tpu.core_type<tc>, window_params = [{transform_indices = @transform_0, window_bounds = array<i64: 32, 512>}, {transform_indices = @transform_1, window_bounds = array<i64: 512, 128>}, {transform_indices = @transform_2, window_bounds = array<i64: 1, 128>}, {transform_indices = @transform_3, window_bounds = array<i64: 32, 128>}]} {
    %c0_i32 = arith.constant 0 : i32
    %0 = arith.cmpi eq, %arg2, %c0_i32 : i32
    %1 = arith.extui %0 : i1 to i32
    %c0_i32_0 = arith.constant 0 : i32
    %2 = arith.cmpi ne, %1, %c0_i32_0 : i32
    scf.if %2 {
      %cst_10 = arith.constant 0.000000e+00 : f32
      %12 = vector.broadcast %cst_10 : f32 to vector<32x128xf32>
      %c0_11 = arith.constant 0 : index
      %c0_12 = arith.constant 0 : index
      %13 = vector.load %arg7[%c0_11, %c0_12] : memref<32x128xf32, #tpu.memory_space<vmem>>, vector<32x128xf32>
      tpu.vector_store %arg7[%c0_11, %c0_12], %12 {strides = array<i32>} : memref<32x128xf32, #tpu.memory_space<vmem>>, vector<32x128xf32>,
    } else {
    }
    %c0 = arith.constant 0 : index
    %c0_1 = arith.constant 0 : index
    %3 = vector.load %arg7[%c0, %c0_1] : memref<32x128xf32, #tpu.memory_space<vmem>>, vector<32x128xf32>
    %c0_2 = arith.constant 0 : index
    %c0_3 = arith.constant 0 : index
    %4 = vector.load %arg3[%c0_2, %c0_3] : memref<32x512xbf16, #tpu.memory_space<vmem>>, vector<32x512xbf16>
    %c0_4 = arith.constant 0 : index
    %c0_5 = arith.constant 0 : index
    %5 = vector.load %arg4[%c0_4, %c0_5] : memref<512x128xbf16, #tpu.memory_space<vmem>>, vector<512x128xbf16>
    %cst = arith.constant dense<0.000000e+00> : vector<32x128xf32>
    %6 = tpu.matmul %4, %5, %cst {dimension_numbers = #tpu.dot_dimension_numbers<[1], [0], [0], [1], [0, 0, 1, 1], [], []>} : vector<32x512xbf16>, vector<512x128xbf16>, vector<32x128xf32> -> vector<32x128xf32>
    %7 = arith.addf %3, %6 : vector<32x128xf32>
    %c0_6 = arith.constant 0 : index
    %c0_7 = arith.constant 0 : index
    %8 = vector.load %arg7[%c0_6, %c0_7] : memref<32x128xf32, #tpu.memory_space<vmem>>, vector<32x128xf32>
    tpu.vector_store %arg7[%c0_6, %c0_7], %7 {strides = array<i32>} : memref<32x128xf32, #tpu.memory_space<vmem>>, vector<32x128xf32>,
    %c0_i32_8 = arith.constant 0 : i32
    %9 = arith.cmpi eq, %arg2, %c0_i32_8 : i32
    %10 = arith.extui %9 : i1 to i32
    %c0_i32_9 = arith.constant 0 : i32
    %11 = arith.cmpi ne, %10, %c0_i32_9 : i32
    scf.if %11 {
      %c0_10 = arith.constant 0 : index
      %c0_11 = arith.constant 0 : index
      %12 = vector.load %arg7[%c0_10, %c0_11] : memref<32x128xf32, #tpu.memory_space<vmem>>, vector<32x128xf32>
      %c0_12 = arith.constant 0 : index
      %c0_13 = arith.constant 0 : index
      %13 = vector.load %arg5[%c0_12, %c0_13] : memref<1x128xf32, #tpu.memory_space<vmem>>, vector<1x128xf32>
      %14 = vector.broadcast %13 : vector<1x128xf32> to vector<32x128xf32>
      %15 = arith.addf %12, %14 : vector<32x128xf32>
      %16 = arith.truncf %15 : vector<32x128xf32> to vector<32x128xbf16>
      %c0_14 = arith.constant 0 : index
      %c0_15 = arith.constant 0 : index
      %17 = vector.load %arg6[%c0_14, %c0_15] : memref<32x128xbf16, #tpu.memory_space<vmem>>, vector<32x128xbf16>
      tpu.vector_store %arg6[%c0_14, %c0_15], %16 {strides = array<i32>} : memref<32x128xbf16, #tpu.memory_space<vmem>>, vector<32x128xbf16>,
    } else {
    }
    return
  }
  func.func @transform_0(%arg0: i32, %arg1: i32, %arg2: i32) -> (i32, i32) {
    %c0_i32 = arith.constant 0 : i32
    return %arg0, %arg2 : i32, i32
  }
  func.func @transform_1(%arg0: i32, %arg1: i32, %arg2: i32) -> (i32, i32) {
    %c0_i32 = arith.constant 0 : i32
    return %arg2, %arg1 : i32, i32
  }
  func.func @transform_2(%arg0: i32, %arg1: i32, %arg2: i32) -> (i32, i32) {
    %c0_i32 = arith.constant 0 : i32
    %c0_i32_0 = arith.constant 0 : i32
    return %c0_i32, %arg1 : i32, i32
  }
  func.func @transform_3(%arg0: i32, %arg1: i32, %arg2: i32) -> (i32, i32) {
    %c0_i32 = arith.constant 0 : i32
    return %arg0, %arg1 : i32, i32
  }
}

module attributes {stable_mosaic.version = 11 : i64} {
  func.func @_cloze_kernel(%arg0: i32, %arg1: i32, %arg2: memref<32x1xi32, #tpu.memory_space<vmem>>, %arg3: memref<32x1xf32, #tpu.memory_space<vmem>>, %arg4: memref<32x128xbf16, #tpu.memory_space<vmem>>, %arg5: memref<128x128xbf16, #tpu.memory_space<vmem>>, %arg6: memref<32x1xf32, #tpu.memory_space<vmem>>, %arg7: memref<32x1xf32, #tpu.memory_space<vmem>>, %arg8: memref<32x1xf32, #tpu.memory_space<vmem>>, %arg9: memref<32x1xf32, #tpu.memory_space<vmem>>) attributes {dimension_semantics = [#tpu.dimension_semantics<parallel>, #tpu.dimension_semantics<arbitrary>], iteration_bounds = array<i64: 1, 4>, scalar_prefetch = 0 : i64, scratch_operands = 3 : i64, tpu.core_type = #tpu.core_type<tc>, window_params = [{transform_indices = @transform_0, window_bounds = array<i64: 32, 1>}, {transform_indices = @transform_1, window_bounds = array<i64: 32, 1>}, {transform_indices = @transform_2, window_bounds = array<i64: 32, 128>}, {transform_indices = @transform_3, window_bounds = array<i64: 128, 128>}, {transform_indices = @transform_4, window_bounds = array<i64: 32, 1>}]} {
    %c0_i32 = arith.constant 0 : i32
    %0 = arith.cmpi eq, %arg1, %c0_i32 : i32
    %1 = arith.extui %0 : i1 to i32
    %c0_i32_0 = arith.constant 0 : i32
    %2 = arith.cmpi ne, %1, %c0_i32_0 : i32
    scf.if %2 {
      %cst_17 = arith.constant 0xFF800000 : f32
      %29 = vector.broadcast %cst_17 : f32 to vector<32x1xf32>
      %c0_18 = arith.constant 0 : index
      %c0_19 = arith.constant 0 : index
      %30 = vector.load %arg7[%c0_18, %c0_19] : memref<32x1xf32, #tpu.memory_space<vmem>>, vector<32x1xf32>
      tpu.vector_store %arg7[%c0_18, %c0_19], %29 {strides = array<i32>} : memref<32x1xf32, #tpu.memory_space<vmem>>, vector<32x1xf32>,
      %cst_20 = arith.constant 0.000000e+00 : f32
      %31 = vector.broadcast %cst_20 : f32 to vector<32x1xf32>
      %c0_21 = arith.constant 0 : index
      %c0_22 = arith.constant 0 : index
      %32 = vector.load %arg8[%c0_21, %c0_22] : memref<32x1xf32, #tpu.memory_space<vmem>>, vector<32x1xf32>
      tpu.vector_store %arg8[%c0_21, %c0_22], %31 {strides = array<i32>} : memref<32x1xf32, #tpu.memory_space<vmem>>, vector<32x1xf32>,
      %cst_23 = arith.constant 0.000000e+00 : f32
      %33 = vector.broadcast %cst_23 : f32 to vector<32x1xf32>
      %c0_24 = arith.constant 0 : index
      %c0_25 = arith.constant 0 : index
      %34 = vector.load %arg9[%c0_24, %c0_25] : memref<32x1xf32, #tpu.memory_space<vmem>>, vector<32x1xf32>
      tpu.vector_store %arg9[%c0_24, %c0_25], %33 {strides = array<i32>} : memref<32x1xf32, #tpu.memory_space<vmem>>, vector<32x1xf32>,
    } else {
    }
    %c0 = arith.constant 0 : index
    %c0_1 = arith.constant 0 : index
    %3 = vector.load %arg4[%c0, %c0_1] : memref<32x128xbf16, #tpu.memory_space<vmem>>, vector<32x128xbf16>
    %c0_2 = arith.constant 0 : index
    %c0_3 = arith.constant 0 : index
    %4 = vector.load %arg5[%c0_2, %c0_3] : memref<128x128xbf16, #tpu.memory_space<vmem>>, vector<128x128xbf16>
    %cst = arith.constant dense<0.000000e+00> : vector<32x128xf32>
    %5 = tpu.matmul %3, %4, %cst {dimension_numbers = #tpu.dot_dimension_numbers<[1], [0], [0], [1], [0, 0, 1, 1], [], []>} : vector<32x128xbf16>, vector<128x128xbf16>, vector<32x128xf32> -> vector<32x128xf32>
    %c128_i32 = arith.constant 128 : i32
    %6 = arith.muli %arg1, %c128_i32 : i32
    %7 = tpu.iota {dimensions = array<i32: 1>} : vector<32x128xi32>
    %8 = vector.broadcast %6 : i32 to vector<32x128xi32>
    %9 = arith.addi %8, %7 : vector<32x128xi32>
    %c0_4 = arith.constant 0 : index
    %c0_5 = arith.constant 0 : index
    %10 = vector.load %arg2[%c0_4, %c0_5] : memref<32x1xi32, #tpu.memory_space<vmem>>, vector<32x1xi32>
    %c0_6 = arith.constant 0 : index
    %c0_7 = arith.constant 0 : index
    %11 = vector.load %arg9[%c0_6, %c0_7] : memref<32x1xf32, #tpu.memory_space<vmem>>, vector<32x1xf32>
    %12 = vector.broadcast %10 : vector<32x1xi32> to vector<32x128xi32>
    %13 = arith.cmpi eq, %9, %12 : vector<32x128xi32>
    %cst_8 = arith.constant 0.000000e+00 : f32
    %14 = vector.broadcast %cst_8 : f32 to vector<32x128xf32>
    %15 = arith.select %13, %5, %14 : vector<32x128xi1>, vector<32x128xf32>
    %cst_9 = arith.constant dense<0.000000e+00> : vector<32xf32>
    %16 = vector.multi_reduction <add>, %15, %cst_9 [1] : vector<32x128xf32> to vector<32xf32>
    %17 = vector.shape_cast %16 : vector<32xf32> to vector<32x1xf32>
    %18 = arith.addf %11, %17 : vector<32x1xf32>
    %c0_10 = arith.constant 0 : index
    %c0_11 = arith.constant 0 : index
    %19 = vector.load %arg9[%c0_10, %c0_11] : memref<32x1xf32, #tpu.memory_space<vmem>>, vector<32x1xf32>
    tpu.vector_store %arg9[%c0_10, %c0_11], %18 {strides = array<i32>} : memref<32x1xf32, #tpu.memory_space<vmem>>, vector<32x1xf32>,
    %c3_i32 = arith.constant 3 : i32
    %20 = arith.cmpi ne, %arg1, %c3_i32 : i32
    %21 = arith.extui %20 : i1 to i32
    %c0_i32_12 = arith.constant 0 : i32
    %22 = arith.cmpi ne, %21, %c0_i32_12 : i32
    scf.if %22 {
      %c0_17 = arith.constant 0 : index
      %c0_18 = arith.constant 0 : index
      %29 = vector.load %arg7[%c0_17, %c0_18] : memref<32x1xf32, #tpu.memory_space<vmem>>, vector<32x1xf32>
      %cst_19 = arith.constant dense<0xFF800000> : vector<32xf32>
      %30 = vector.multi_reduction <maximumf>, %5, %cst_19 [1] : vector<32x128xf32> to vector<32xf32>
      %31 = vector.shape_cast %30 : vector<32xf32> to vector<32x1xf32>
      %32 = arith.maximumf %29, %31 : vector<32x1xf32>
      %c0_20 = arith.constant 0 : index
      %c0_21 = arith.constant 0 : index
      %33 = vector.load %arg7[%c0_20, %c0_21] : memref<32x1xf32, #tpu.memory_space<vmem>>, vector<32x1xf32>
      %34 = arith.subf %33, %32 : vector<32x1xf32>
      %35 = math.exp %34 : vector<32x1xf32>
      %c0_22 = arith.constant 0 : index
      %c0_23 = arith.constant 0 : index
      %36 = vector.load %arg8[%c0_22, %c0_23] : memref<32x1xf32, #tpu.memory_space<vmem>>, vector<32x1xf32>
      %37 = arith.mulf %35, %36 : vector<32x1xf32>
      %38 = vector.broadcast %32 : vector<32x1xf32> to vector<32x128xf32>
      %39 = arith.subf %5, %38 : vector<32x128xf32>
      %40 = math.exp %39 : vector<32x128xf32>
      %cst_24 = arith.constant dense<0.000000e+00> : vector<32xf32>
      %41 = vector.multi_reduction <add>, %40, %cst_24 [1] : vector<32x128xf32> to vector<32xf32>
      %42 = vector.shape_cast %41 : vector<32xf32> to vector<32x1xf32>
      %43 = arith.addf %37, %42 : vector<32x1xf32>
      %c0_25 = arith.constant 0 : index
      %c0_26 = arith.constant 0 : index
      %44 = vector.load %arg8[%c0_25, %c0_26] : memref<32x1xf32, #tpu.memory_space<vmem>>, vector<32x1xf32>
      tpu.vector_store %arg8[%c0_25, %c0_26], %43 {strides = array<i32>} : memref<32x1xf32, #tpu.memory_space<vmem>>, vector<32x1xf32>,
      %c0_27 = arith.constant 0 : index
      %c0_28 = arith.constant 0 : index
      %45 = vector.load %arg7[%c0_27, %c0_28] : memref<32x1xf32, #tpu.memory_space<vmem>>, vector<32x1xf32>
      tpu.vector_store %arg7[%c0_27, %c0_28], %32 {strides = array<i32>} : memref<32x1xf32, #tpu.memory_space<vmem>>, vector<32x1xf32>,
    } else {
    }
    %c3_i32_13 = arith.constant 3 : i32
    %23 = arith.cmpi eq, %arg1, %c3_i32_13 : i32
    %24 = arith.extui %23 : i1 to i32
    %c0_i32_14 = arith.constant 0 : i32
    %25 = arith.cmpi ne, %24, %c0_i32_14 : i32
    scf.if %25 {
      %c448_i32 = arith.constant 448 : i32
      %29 = vector.broadcast %c448_i32 : i32 to vector<32x128xi32>
      %30 = arith.cmpi slt, %9, %29 : vector<32x128xi32>
      %cst_17 = arith.constant -1.000000e+30 : f32
      %31 = vector.broadcast %cst_17 : f32 to vector<32x128xf32>
      %32 = arith.select %30, %5, %31 : vector<32x128xi1>, vector<32x128xf32>
      %c0_18 = arith.constant 0 : index
      %c0_19 = arith.constant 0 : index
      %33 = vector.load %arg7[%c0_18, %c0_19] : memref<32x1xf32, #tpu.memory_space<vmem>>, vector<32x1xf32>
      %cst_20 = arith.constant dense<0xFF800000> : vector<32xf32>
      %34 = vector.multi_reduction <maximumf>, %32, %cst_20 [1] : vector<32x128xf32> to vector<32xf32>
      %35 = vector.shape_cast %34 : vector<32xf32> to vector<32x1xf32>
      %36 = arith.maximumf %33, %35 : vector<32x1xf32>
      %c0_21 = arith.constant 0 : index
      %c0_22 = arith.constant 0 : index
      %37 = vector.load %arg7[%c0_21, %c0_22] : memref<32x1xf32, #tpu.memory_space<vmem>>, vector<32x1xf32>
      %38 = arith.subf %37, %36 : vector<32x1xf32>
      %39 = math.exp %38 : vector<32x1xf32>
      %c0_23 = arith.constant 0 : index
      %c0_24 = arith.constant 0 : index
      %40 = vector.load %arg8[%c0_23, %c0_24] : memref<32x1xf32, #tpu.memory_space<vmem>>, vector<32x1xf32>
      %41 = arith.mulf %39, %40 : vector<32x1xf32>
      %42 = vector.broadcast %36 : vector<32x1xf32> to vector<32x128xf32>
      %43 = arith.subf %32, %42 : vector<32x128xf32>
      %44 = math.exp %43 : vector<32x128xf32>
      %cst_25 = arith.constant dense<0.000000e+00> : vector<32xf32>
      %45 = vector.multi_reduction <add>, %44, %cst_25 [1] : vector<32x128xf32> to vector<32xf32>
      %46 = vector.shape_cast %45 : vector<32xf32> to vector<32x1xf32>
      %47 = arith.addf %41, %46 : vector<32x1xf32>
      %c0_26 = arith.constant 0 : index
      %c0_27 = arith.constant 0 : index
      %48 = vector.load %arg8[%c0_26, %c0_27] : memref<32x1xf32, #tpu.memory_space<vmem>>, vector<32x1xf32>
      tpu.vector_store %arg8[%c0_26, %c0_27], %47 {strides = array<i32>} : memref<32x1xf32, #tpu.memory_space<vmem>>, vector<32x1xf32>,
      %c0_28 = arith.constant 0 : index
      %c0_29 = arith.constant 0 : index
      %49 = vector.load %arg7[%c0_28, %c0_29] : memref<32x1xf32, #tpu.memory_space<vmem>>, vector<32x1xf32>
      tpu.vector_store %arg7[%c0_28, %c0_29], %36 {strides = array<i32>} : memref<32x1xf32, #tpu.memory_space<vmem>>, vector<32x1xf32>,
    } else {
    }
    %c3_i32_15 = arith.constant 3 : i32
    %26 = arith.cmpi eq, %arg1, %c3_i32_15 : i32
    %27 = arith.extui %26 : i1 to i32
    %c0_i32_16 = arith.constant 0 : i32
    %28 = arith.cmpi ne, %27, %c0_i32_16 : i32
    scf.if %28 {
      %c0_17 = arith.constant 0 : index
      %c0_18 = arith.constant 0 : index
      %29 = vector.load %arg9[%c0_17, %c0_18] : memref<32x1xf32, #tpu.memory_space<vmem>>, vector<32x1xf32>
      %c0_19 = arith.constant 0 : index
      %c0_20 = arith.constant 0 : index
      %30 = vector.load %arg7[%c0_19, %c0_20] : memref<32x1xf32, #tpu.memory_space<vmem>>, vector<32x1xf32>
      %c0_21 = arith.constant 0 : index
      %c0_22 = arith.constant 0 : index
      %31 = vector.load %arg8[%c0_21, %c0_22] : memref<32x1xf32, #tpu.memory_space<vmem>>, vector<32x1xf32>
      %32 = math.log %31 : vector<32x1xf32>
      %33 = arith.addf %30, %32 : vector<32x1xf32>
      %34 = arith.subf %29, %33 : vector<32x1xf32>
      %c0_23 = arith.constant 0 : index
      %c0_24 = arith.constant 0 : index
      %35 = vector.load %arg3[%c0_23, %c0_24] : memref<32x1xf32, #tpu.memory_space<vmem>>, vector<32x1xf32>
      %36 = arith.mulf %34, %35 : vector<32x1xf32>
      %c0_25 = arith.constant 0 : index
      %c0_26 = arith.constant 0 : index
      %37 = vector.load %arg6[%c0_25, %c0_26] : memref<32x1xf32, #tpu.memory_space<vmem>>, vector<32x1xf32>
      tpu.vector_store %arg6[%c0_25, %c0_26], %36 {strides = array<i32>} : memref<32x1xf32, #tpu.memory_space<vmem>>, vector<32x1xf32>,
    } else {
    }
    return
  }
  func.func @transform_0(%arg0: i32, %arg1: i32) -> (i32, i32) {
    %c0_i32 = arith.constant 0 : i32
    %c0_i32_0 = arith.constant 0 : i32
    return %arg0, %c0_i32 : i32, i32
  }
  func.func @transform_1(%arg0: i32, %arg1: i32) -> (i32, i32) {
    %c0_i32 = arith.constant 0 : i32
    %c0_i32_0 = arith.constant 0 : i32
    return %arg0, %c0_i32 : i32, i32
  }
  func.func @transform_2(%arg0: i32, %arg1: i32) -> (i32, i32) {
    %c0_i32 = arith.constant 0 : i32
    %c0_i32_0 = arith.constant 0 : i32
    return %arg0, %c0_i32 : i32, i32
  }
  func.func @transform_3(%arg0: i32, %arg1: i32) -> (i32, i32) {
    %c0_i32 = arith.constant 0 : i32
    %c0_i32_0 = arith.constant 0 : i32
    return %c0_i32, %arg1 : i32, i32
  }
  func.func @transform_4(%arg0: i32, %arg1: i32) -> (i32, i32) {
    %c0_i32 = arith.constant 0 : i32
    %c0_i32_0 = arith.constant 0 : i32
    return %arg0, %c0_i32 : i32, i32
  }
}

</mosaic_0001>

<bundles_post_ra>
// kernel: glm_for_multi_token_cloze.6
= control target key start
LH: loop header
LB: loop body
LE: loop exit
PB: predicated region body
PF: predicated region fallthrough
CT: control target
= control target key end

     0   :  { %s289_s1 = inlined_call_operand.vmem [shape: bf16[128,128], index: 1, kind: input, shape index: {}]   ;;  %s290_s2 = inlined_call_operand.vmem [shape: f32[1,128], index: 2, kind: input, shape index: {}]   ;;  %s291_s0 = inlined_call_operand.vmem [shape: bf16[32,128], index: 0, kind: input, shape index: {}]   ;;  %s292_s3 = inlined_call_operand.vmem [shape: bf16[32,128], index: 3, kind: output, shape index: {}]  }
   0x1   :  { %v209_v0 = vld [vmem:[%s289_s1 + $0x38] sm:$0xff]  ;;  %v208_v1 = vld [vmem:[%s289_s1 + $0x30] sm:$0xff]  ;;  %v207_v2 = vld [vmem:[%s289_s1 + $0x28] sm:$0xff] }
   0x2   :  { %106 = vmatpush.bf16.msra.mxu0 %v209_v0  ;;  %221 = vmatpush.bf16.msra.mxu1 %v209_v0  ;;  %v206_v3 = vld [vmem:[%s289_s1 + $0x20] sm:$0xff]  ;;  %v205_v4 = vld [vmem:[%s289_s1 + $0x18] sm:$0xff]  ;;  %v204_v5 = vld [vmem:[%s289_s1 + $0x10] sm:$0xff] }
   0x3   :  { %v203_v6 = vld [vmem:[%s289_s1 + $0x8] sm:$0xff]  ;;  %v202_v7 = vld [vmem:[%s289_s1] sm:$0xff] }
   0x4   :  { %v200_v8 = vld [vmem:[%s291_s0] sm:$0xff]  ;;  %v201_v9 = vld [vmem:[%s291_s0 + $0x8] sm:$0xff] }
   0x5   :  { %v229_v12 = vld [vmem:[%s290_s2] ss:$0 sm:$0xff] }
   0x6   :  { %107 = vmatpush.bf16.msra.mxu0 %v208_v1  ;;  %222 = vmatpush.bf16.msra.mxu1 %v208_v1 }
   0xa   :  { %108 = vmatpush.bf16.msra.mxu0 %v207_v2  ;;  %223 = vmatpush.bf16.msra.mxu1 %v207_v2 }
   0xe   :  { %109 = vmatpush.bf16.msra.mxu0 %v206_v3  ;;  %224 = vmatpush.bf16.msra.mxu1 %v206_v3 }
  0x12   :  { %110 = vmatpush.bf16.msra.mxu0 %v205_v4  ;;  %225 = vmatpush.bf16.msra.mxu1 %v205_v4 }
  0x16   :  { %111 = vmatpush.bf16.msra.mxu0 %v204_v5  ;;  %226 = vmatpush.bf16.msra.mxu1 %v204_v5 }
  0x1a   :  { %112 = vmatpush.bf16.msra.mxu0 %v203_v6  ;;  %227 = vmatpush.bf16.msra.mxu1 %v203_v6 }
  0x1e   :  { %113 = vmatpush.bf16.msra.mxu0 %v202_v7  ;;  %228 = vmatpush.bf16.msra.mxu1 %v202_v7 }
  0x21   :  { %114 = vmatmul.bf16.vlgmr.msra.gmra.mxu0 %v200_v8  ;;  %119 = vmatmul.bf16.vlgmr.msra.gmra.mxu1 %v201_v9 }
  0x9e   :  { %v115_v10 = vpop.f32.mrf.mxu0  ;;  %v120_v11 = vpop.f32.mrf.mxu1 }
  0x9f   :  { %v144_v15 = vadd.f32 %v229_v12, %v115_v10  ;;  %v146_v16 = vadd.f32 %v229_v12, %v120_v11 }
  0xa6   :  { %v117_v13 = vpop.f32.mrf.mxu0  ;;  %v122_v14 = vpop.f32.mrf.mxu1 }
  0xa7   :  { %v145_v17 = vadd.f32 %v229_v12, %v117_v13  ;;  %v147_v18 = vadd.f32 %v229_v12, %v122_v14 }
  0xa9   :  { %v213_v19 = vpack.c.bf16 %v145_v17, %v144_v15  ;;  %v218_v20 = vpack.c.bf16 %v147_v18, %v146_v16 }
  0xab   :  { %214 = vst [vmem:[%s292_s3] sm:$0xff] %v213_v19  }
  0xac   :  { %220 = vst [vmem:[%s292_s3 + $0x8] sm:$0xff] %v218_v20  }

// kernel: glm_for_multi_token_cloze.5
= control target key start
LH: loop header
LB: loop body
LE: loop exit
PB: predicated region body
PF: predicated region fallthrough
CT: control target
= control target key end

     0   :  { %s689_s1 = inlined_call_operand.vmem [shape: bf16[128,384], index: 1, kind: input, shape index: {}]   ;;  %s690_s0 = inlined_call_operand.vmem [shape: bf16[32,128], index: 0, kind: input, shape index: {}]   ;;  %s691_s2 = inlined_call_operand.vmem [shape: f32[1,384], index: 2, kind: input, shape index: {}]   ;;  %s692_s3 = inlined_call_operand.vmem [shape: bf16[32,384], index: 3, kind: output, shape index: {}]  }
   0x1   :  { %v448_v0 = vld [vmem:[%s689_s1 + $0xa8] sm:$0xf]  ;;  %v482_v1 = vld [vmem:[%s689_s1 + $0xb0] sm:$0xf0]  ;;  %v481_v2 = vld [vmem:[%s689_s1 + $0xac] sm:$0xf] }
   0x2   :  { %v449_v3 = vor.u32 %v482_v1, %v448_v0  ;;  %v450_v4 = vld [vmem:[%s689_s1 + $0xb4] sm:$0xf0]  ;;  %v456_v5 = vld [vmem:[%s689_s1 + $0xb0] sm:$0xf]  ;;  %v483_v6 = vld [vmem:[%s689_s1 + $0xb8] sm:$0xf0] }
   0x3   :  { %v453_v7 = vor.u32 %v481_v2, %v450_v4  ;;  %v457_v8 = vor.u32 %v483_v6, %v456_v5  ;;  %v436_v9 = vld [vmem:[%s689_s1 + $0x90] sm:$0xf]  ;;  %v479_v10 = vld [vmem:[%s689_s1 + $0x98] sm:$0xf0]  ;;  %v478_v11 = vld [vmem:[%s689_s1 + $0x94] sm:$0xf] }
   0x4   :  { %218 = vmatpush.bf16.msra.mxu0 %v449_v3  ;;  %v437_v12 = vor.u32 %v479_v10, %v436_v9  ;;  %v438_v13 = vld [vmem:[%s689_s1 + $0x9c] sm:$0xf0]  ;;  %v444_v14 = vld [vmem:[%s689_s1 + $0x98] sm:$0xf]  ;;  %v480_v15 = vld [vmem:[%s689_s1 + $0xa0] sm:$0xf0]  ;;  %484 = vmatpush.bf16.msra.mxu3 %v449_v3 }
   0x5   :  { %237 = vmatpush.bf16.msra.mxu1 %v453_v7  ;;  %256 = vmatpush.bf16.msra.mxu2 %v457_v8  ;;  %v441_v16 = vor.u32 %v478_v11, %v438_v13  ;;  %v445_v17 = vor.u32 %v480_v15, %v444_v14  ;;  %v424_v18 = vld [vmem:[%s689_s1 + $0x78] sm:$0xf]  ;;  %v476_v19 = vld [vmem:[%s689_s1 + $0x80] sm:$0xf0]  ;;  %v475_v20 = vld [vmem:[%s689_s1 + $0x7c] sm:$0xf] }
   0x6   :  { %v426_v21 = vld [vmem:[%s689_s1 + $0x84] sm:$0xf0]  ;;  %v432_v22 = vld [vmem:[%s689_s1 + $0x80] sm:$0xf]  ;;  %v477_v23 = vld [vmem:[%s689_s1 + $0x88] sm:$0xf0]  ;;  %v425_v24 = vor.u32 %v476_v19, %v424_v18 }
   0x7   :  { %v429_v25 = vor.u32 %v475_v20, %v426_v21  ;;  %v433_v26 = vor.u32 %v477_v23, %v432_v22  ;;  %v412_v27 = vld [vmem:[%s689_s1 + $0x60] sm:$0xf]  ;;  %v473_v28 = vld [vmem:[%s689_s1 + $0x68] sm:$0xf0]  ;;  %v472_v29 = vld [vmem:[%s689_s1 + $0x64] sm:$0xf] }
   0x8   :  { %219 = vmatpush.bf16.msra.mxu0 %v437_v12  ;;  %485 = vmatpush.bf16.msra.mxu3 %v437_v12  ;;  %v414_v30 = vld [vmem:[%s689_s1 + $0x6c] sm:$0xf0]  ;;  %v420_v31 = vld [vmem:[%s689_s1 + $0x68] sm:$0xf]  ;;  %v474_v32 = vld [vmem:[%s689_s1 + $0x70] sm:$0xf0]  ;;  %v413_v33 = vor.u32 %v473_v28, %v412_v27 }
   0x9   :  { %238 = vmatpush.bf16.msra.mxu1 %v441_v16  ;;  %257 = vmatpush.bf16.msra.mxu2 %v445_v17  ;;  %v417_v34 = vor.u32 %v472_v29, %v414_v30  ;;  %v421_v35 = vor.u32 %v474_v32, %v420_v31  ;;  %v400_v36 = vld [vmem:[%s689_s1 + $0x48] sm:$0xf]  ;;  %v470_v37 = vld [vmem:[%s689_s1 + $0x50] sm:$0xf0]  ;;  %v469_v38 = vld [vmem:[%s689_s1 + $0x4c] sm:$0xf] }
   0xa   :  { %v402_v39 = vld [vmem:[%s689_s1 + $0x54] sm:$0xf0]  ;;  %v408_v40 = vld [vmem:[%s689_s1 + $0x50] sm:$0xf]  ;;  %v471_v41 = vld [vmem:[%s689_s1 + $0x58] sm:$0xf0]  ;;  %v401_v42 = vor.u32 %v470_v37, %v400_v36 }
   0xb   :  { %v405_v43 = vor.u32 %v469_v38, %v402_v39  ;;  %v409_v44 = vor.u32 %v471_v41, %v408_v40  ;;  %v388_v45 = vld [vmem:[%s689_s1 + $0x30] sm:$0xf]  ;;  %v467_v46 = vld [vmem:[%s689_s1 + $0x38] sm:$0xf0]  ;;  %v466_v47 = vld [vmem:[%s689_s1 + $0x34] sm:$0xf] }
   0xc   :  { %220 = vmatpush.bf16.msra.mxu0 %v425_v24  ;;  %486 = vmatpush.bf16.msra.mxu3 %v425_v24  ;;  %v390_v48 = vld [vmem:[%s689_s1 + $0x3c] sm:$0xf0]  ;;  %v396_v49 = vld [vmem:[%s689_s1 + $0x38] sm:$0xf]  ;;  %v468_v50 = vld [vmem:[%s689_s1 + $0x40] sm:$0xf0]  ;;  %v389_v51 = vor.u32 %v467_v46, %v388_v45 }
   0xd   :  { %239 = vmatpush.bf16.msra.mxu1 %v429_v25  ;;  %258 = vmatpush.bf16.msra.mxu2 %v433_v26  ;;  %v393_v52 = vor.u32 %v466_v47, %v390_v48  ;;  %v397_v53 = vor.u32 %v468_v50, %v396_v49  ;;  %v376_v54 = vld [vmem:[%s689_s1 + $0x18] sm:$0xf]  ;;  %v464_v55 = vld [vmem:[%s689_s1 + $0x20] sm:$0xf0]  ;;  %v463_v56 = vld [vmem:[%s689_s1 + $0x1c] sm:$0xf] }
   0xe   :  { %v378_v57 = vld [vmem:[%s689_s1 + $0x24] sm:$0xf0]  ;;  %v384_v58 = vld [vmem:[%s689_s1 + $0x20] sm:$0xf]  ;;  %v465_v59 = vld [vmem:[%s689_s1 + $0x28] sm:$0xf0]  ;;  %v377_v60 = vor.u32 %v464_v55, %v376_v54 }
   0xf   :  { %v381_v61 = vor.u32 %v463_v56, %v378_v57  ;;  %v385_v62 = vor.u32 %v465_v59, %v384_v58  ;;  %v364_v63 = vld [vmem:[%s689_s1] sm:$0xf]  ;;  %v461_v0 = vld [vmem:[%s689_s1 + $0x8] sm:$0xf0]  ;;  %v460_v1 = vld [vmem:[%s689_s1 + $0x4] sm:$0xf] }
  0x10   :  { %221 = vmatpush.bf16.msra.mxu0 %v413_v33  ;;  %487 = vmatpush.bf16.msra.mxu3 %v413_v33  ;;  %v366_v2 = vld [vmem:[%s689_s1 + $0xc] sm:$0xf0]  ;;  %v372_v3 = vld [vmem:[%s689_s1 + $0x8] sm:$0xf]  ;;  %v462_v4 = vld [vmem:[%s689_s1 + $0x10] sm:$0xf0]  ;;  %v365_v5 = vor.u32 %v461_v0, %v364_v63 }
  0x11   :  { %240 = vmatpush.bf16.msra.mxu1 %v417_v34  ;;  %259 = vmatpush.bf16.msra.mxu2 %v421_v35  ;;  %v369_v6 = vor.u32 %v460_v1, %v366_v2  ;;  %v373_v7 = vor.u32 %v462_v4, %v372_v3  ;;  %v458_v8 = vld [vmem:[%s690_s0] sm:$0xff]  ;;  %v459_v9 = vld [vmem:[%s690_s0 + $0x8] sm:$0xff] }
  0x12   :  { %v314_v10 = vld [vmem:[%s691_s2] sm:$0x7] }
  0x13   :  { %v316_v11 = vperm.slane %v314_v10, 0  ;;  %v317_v12 = vperm.slane %v314_v10, 1  ;;  %v318_v18 = vperm.slane %v314_v10, 2 }
  0x14   :  { %222 = vmatpush.bf16.msra.mxu0 %v401_v42  ;;  %488 = vmatpush.bf16.msra.mxu3 %v401_v42 }
  0x15   :  { %241 = vmatpush.bf16.msra.mxu1 %v405_v43  ;;  %260 = vmatpush.bf16.msra.mxu2 %v409_v44 }
  0x18   :  { %223 = vmatpush.bf16.msra.mxu0 %v389_v51  ;;  %489 = vmatpush.bf16.msra.mxu3 %v389_v51 }
  0x19   :  { %242 = vmatpush.bf16.msra.mxu1 %v393_v52  ;;  %261 = vmatpush.bf16.msra.mxu2 %v397_v53 }
  0x1c   :  { %224 = vmatpush.bf16.msra.mxu0 %v377_v60  ;;  %490 = vmatpush.bf16.msra.mxu3 %v377_v60 }
  0x1d   :  { %243 = vmatpush.bf16.msra.mxu1 %v381_v61  ;;  %262 = vmatpush.bf16.msra.mxu2 %v385_v62 }
  0x20   :  { %225 = vmatpush.bf16.msra.mxu0 %v365_v5  ;;  %491 = vmatpush.bf16.msra.mxu3 %v365_v5 }
  0x21   :  { %244 = vmatpush.bf16.msra.mxu1 %v369_v6  ;;  %263 = vmatpush.bf16.msra.mxu2 %v373_v7 }
  0x23   :  { %226 = vmatmul.bf16.vlgmr.msra.gmra.mxu0 %v458_v8  ;;  %231 = vmatmul.bf16.vlgmr.msra.gmra.mxu3 %v459_v9 }
  0x24   :  { %245 = vmatmul.bf16.vlgmr.msra.gmra.mxu1 %v458_v8  ;;  %264 = vmatmul.bf16.vlgmr.msra.gmra.mxu2 %v458_v8 }
  0x34   :  { %250 = vmatmul.bf16.gmra.mxu1 %v459_v9  ;;  %269 = vmatmul.bf16.gmra.mxu2 %v459_v9 }
  0xa0   :  { %v227_v13 = vpop.f32.mrf.mxu0 }
  0xa1   :  { %v322_v14 = vadd.f32 %v316_v11, %v227_v13  ;;  %v246_v15 = vpop.f32.mrf.mxu1 }
  0xa2   :  { %v323_v16 = vadd.f32 %v317_v12, %v246_v15 }
  0xa4   :  { %v334_v17 = vpack.c.bf16 %v323_v16, %v322_v14 }
  0xa6   :  { %342 = vst [vmem:[%s692_s3] sm:$0xff] %v334_v17  ;;  %v232_v27 = vpop.f32.mrf.mxu3 }
  0xa7   :  { %v265_v19 = vpop.f32.mrf.mxu2  ;;  %v328_v29 = vadd.f32 %v316_v11, %v232_v27 }
  0xa8   :  { %v324_v20 = vadd.f32 %v318_v18, %v265_v19  ;;  %v229_v21 = vpop.f32.mrf.mxu0 }
  0xa9   :  { %v325_v22 = vadd.f32 %v316_v11, %v229_v21  ;;  %v248_v23 = vpop.f32.mrf.mxu1 }
  0xaa   :  { %v335_v24 = vpack.c.bf16 %v324_v20, %v324_v20  ;;  %v326_v25 = vadd.f32 %v317_v12, %v248_v23 }
  0xac   :  { %343 = vst [vmem:[%s692_s3 + $0x8] sm:$0xf] %v335_v24  ;;  %v336_v26 = vpack.c.bf16 %v326_v25, %v325_v22 }
  0xae   :  { %344 = vst [vmem:[%s692_s3 + $0xc] sm:$0xff] %v336_v26  ;;  %v234_v35 = vpop.f32.mrf.mxu3 }
  0xaf   :  { %v267_v28 = vpop.f32.mrf.mxu2  ;;  %v331_v39 = vadd.f32 %v316_v11, %v234_v35 }
  0xb0   :  { %v327_v30 = vadd.f32 %v318_v18, %v267_v28 }
  0xb1   :  { %v251_v31 = vpop.f32.mrf.mxu1 }
  0xb2   :  { %v337_v32 = vpack.c.bf16 %v327_v30, %v327_v30  ;;  %v329_v33 = vadd.f32 %v317_v12, %v251_v31 }
  0xb4   :  { %345 = vst [vmem:[%s692_s3 + $0x14] sm:$0xf] %v337_v32  ;;  %v338_v34 = vpack.c.bf16 %v329_v33, %v328_v29 }
  0xb6   :  { %346 = vst [vmem:[%s692_s3 + $0x18] sm:$0xff] %v338_v34 }
  0xb7   :  { %v270_v36 = vpop.f32.mrf.mxu2 }
  0xb8   :  { %v330_v37 = vadd.f32 %v318_v18, %v270_v36 }
  0xb9   :  { %v253_v38 = vpop.f32.mrf.mxu1 }
  0xba   :  { %v339_v40 = vpack.c.bf16 %v330_v37, %v330_v37  ;;  %v332_v41 = vadd.f32 %v317_v12, %v253_v38 }
  0xbc   :  { %347 = vst [vmem:[%s692_s3 + $0x20] sm:$0xf] %v339_v40  ;;  %v340_v42 = vpack.c.bf16 %v332_v41, %v331_v39 }
  0xbe   :  { %348 = vst [vmem:[%s692_s3 + $0x24] sm:$0xff] %v340_v42 }
  0xbf   :  { %v272_v43 = vpop.f32.mrf.mxu2 }
  0xc0   :  { %v333_v44 = vadd.f32 %v318_v18, %v272_v43 }
  0xc2   :  { %v341_v45 = vpack.c.bf16 %v333_v44, %v333_v44 }
  0xc4   :  { %349 = vst [vmem:[%s692_s3 + $0x2c] sm:$0xf] %v341_v45 }

// kernel: glm_for_multi_token_cloze.7
= control target key start
LH: loop header
LB: loop body
LE: loop exit
PB: predicated region body
PF: predicated region fallthrough
CT: control target
= control target key end

     0   :  { %s1151_s1 = inlined_call_operand.vmem [shape: bf16[128,512], index: 1, kind: input, shape index: {}]   ;;  %s1152_s0 = inlined_call_operand.vmem [shape: bf16[32,128], index: 0, kind: input, shape index: {}]   ;;  %s1153_s2 = inlined_call_operand.vmem [shape: f32[1,512], index: 2, kind: input, shape index: {}]   ;;  %s1154_s3 = inlined_call_operand.vmem [shape: bf16[32,512], index: 3, kind: output, shape index: {}]  }
   0x1   :  { %v697_v0 = vld [vmem:[%s1151_s1 + $0xe0] sm:$0xf]  ;;  %v743_v1 = vld [vmem:[%s1151_s1 + $0xec] sm:$0xf0]  ;;  %v741_v2 = vld [vmem:[%s1151_s1 + $0xe4] sm:$0xf] }
   0x2   :  { %v698_v3 = vor.u32 %v743_v1, %v697_v0  ;;  %v699_v4 = vld [vmem:[%s1151_s1 + $0xf0] sm:$0xf0]  ;;  %v705_v5 = vld [vmem:[%s1151_s1 + $0xe8] sm:$0xf]  ;;  %v744_v6 = vld [vmem:[%s1151_s1 + $0xf4] sm:$0xf0] }
   0x3   :  { %v702_v7 = vor.u32 %v741_v2, %v699_v4  ;;  %v706_v8 = vor.u32 %v744_v6, %v705_v5  ;;  %v742_v9 = vld [vmem:[%s1151_s1 + $0xec] sm:$0xf]  ;;  %v707_v10 = vld [vmem:[%s1151_s1 + $0xf8] sm:$0xf0]  ;;  %v681_v11 = vld [vmem:[%s1151_s1 + $0xc0] sm:$0xf] }
   0x4   :  { %258 = vmatpush.bf16.msra.mxu0 %v698_v3  ;;  %v710_v12 = vor.u32 %v742_v9, %v707_v10  ;;  %v739_v13 = vld [vmem:[%s1151_s1 + $0xcc] sm:$0xf0]  ;;  %v737_v14 = vld [vmem:[%s1151_s1 + $0xc4] sm:$0xf]  ;;  %v683_v15 = vld [vmem:[%s1151_s1 + $0xd0] sm:$0xf0] }
   0x5   :  { %277 = vmatpush.bf16.msra.mxu1 %v702_v7  ;;  %296 = vmatpush.bf16.msra.mxu2 %v706_v8  ;;  %v682_v16 = vor.u32 %v739_v13, %v681_v11  ;;  %v686_v17 = vor.u32 %v737_v14, %v683_v15  ;;  %v689_v18 = vld [vmem:[%s1151_s1 + $0xc8] sm:$0xf]  ;;  %v740_v19 = vld [vmem:[%s1151_s1 + $0xd4] sm:$0xf0]  ;;  %v738_v20 = vld [vmem:[%s1151_s1 + $0xcc] sm:$0xf] }
   0x6   :  { %315 = vmatpush.bf16.msra.mxu3 %v710_v12  ;;  %v690_v21 = vor.u32 %v740_v19, %v689_v18  ;;  %v691_v22 = vld [vmem:[%s1151_s1 + $0xd8] sm:$0xf0]  ;;  %v665_v23 = vld [vmem:[%s1151_s1 + $0xa0] sm:$0xf]  ;;  %v735_v24 = vld [vmem:[%s1151_s1 + $0xac] sm:$0xf0] }
   0x7   :  { %v694_v25 = vor.u32 %v738_v20, %v691_v22  ;;  %v733_v26 = vld [vmem:[%s1151_s1 + $0xa4] sm:$0xf]  ;;  %v667_v27 = vld [vmem:[%s1151_s1 + $0xb0] sm:$0xf0]  ;;  %v673_v28 = vld [vmem:[%s1151_s1 + $0xa8] sm:$0xf]  ;;  %v666_v29 = vor.u32 %v735_v24, %v665_v23 }
   0x8   :  { %259 = vmatpush.bf16.msra.mxu0 %v682_v16  ;;  %v736_v30 = vld [vmem:[%s1151_s1 + $0xb4] sm:$0xf0]  ;;  %v734_v31 = vld [vmem:[%s1151_s1 + $0xac] sm:$0xf]  ;;  %v675_v32 = vld [vmem:[%s1151_s1 + $0xb8] sm:$0xf0]  ;;  %v670_v33 = vor.u32 %v733_v26, %v667_v27 }
   0x9   :  { %278 = vmatpush.bf16.msra.mxu1 %v686_v17  ;;  %297 = vmatpush.bf16.msra.mxu2 %v690_v21  ;;  %v674_v34 = vor.u32 %v736_v30, %v673_v28  ;;  %v649_v35 = vld [vmem:[%s1151_s1 + $0x80] sm:$0xf]  ;;  %v731_v36 = vld [vmem:[%s1151_s1 + $0x8c] sm:$0xf0]  ;;  %v729_v37 = vld [vmem:[%s1151_s1 + $0x84] sm:$0xf]  ;;  %v678_v38 = vor.u32 %v734_v31, %v675_v32 }
   0xa   :  { %316 = vmatpush.bf16.msra.mxu3 %v694_v25  ;;  %v651_v39 = vld [vmem:[%s1151_s1 + $0x90] sm:$0xf0]  ;;  %v657_v40 = vld [vmem:[%s1151_s1 + $0x88] sm:$0xf]  ;;  %v732_v41 = vld [vmem:[%s1151_s1 + $0x94] sm:$0xf0]  ;;  %v650_v44 = vor.u32 %v731_v36, %v649_v35 }
   0xb   :  { %v730_v42 = vld [vmem:[%s1151_s1 + $0x8c] sm:$0xf]  ;;  %v659_v43 = vld [vmem:[%s1151_s1 + $0x98] sm:$0xf0]  ;;  %v654_v45 = vor.u32 %v729_v37, %v651_v39  ;;  %v658_v46 = vor.u32 %v732_v41, %v657_v40  ;;  %v633_v47 = vld [vmem:[%s1151_s1 + $0x60] sm:$0xf] }
   0xc   :  { %260 = vmatpush.bf16.msra.mxu0 %v666_v29  ;;  %v727_v48 = vld [vmem:[%s1151_s1 + $0x6c] sm:$0xf0]  ;;  %v725_v49 = vld [vmem:[%s1151_s1 + $0x64] sm:$0xf]  ;;  %v662_v50 = vor.u32 %v730_v42, %v659_v43  ;;  %v635_v51 = vld [vmem:[%s1151_s1 + $0x70] sm:$0xf0] }
   0xd   :  { %279 = vmatpush.bf16.msra.mxu1 %v670_v33  ;;  %298 = vmatpush.bf16.msra.mxu2 %v674_v34  ;;  %v641_v52 = vld [vmem:[%s1151_s1 + $0x68] sm:$0xf]  ;;  %v728_v53 = vld [vmem:[%s1151_s1 + $0x74] sm:$0xf0]  ;;  %v726_v54 = vld [vmem:[%s1151_s1 + $0x6c] sm:$0xf]  ;;  %v634_v56 = vor.u32 %v727_v48, %v633_v47  ;;  %v638_v57 = vor.u32 %v725_v49, %v635_v51 }
   0xe   :  { %317 = vmatpush.bf16.msra.mxu3 %v678_v38  ;;  %v643_v55 = vld [vmem:[%s1151_s1 + $0x78] sm:$0xf0]  ;;  %v642_v58 = vor.u32 %v728_v53, %v641_v52  ;;  %v617_v59 = vld [vmem:[%s1151_s1 + $0x40] sm:$0xf]  ;;  %v723_v60 = vld [vmem:[%s1151_s1 + $0x4c] sm:$0xf0] }
   0xf   :  { %v721_v61 = vld [vmem:[%s1151_s1 + $0x44] sm:$0xf]  ;;  %v646_v62 = vor.u32 %v726_v54, %v643_v55  ;;  %v619_v63 = vld [vmem:[%s1151_s1 + $0x50] sm:$0xf0]  ;;  %v625_v0 = vld [vmem:[%s1151_s1 + $0x48] sm:$0xf]  ;;  %v618_v4 = vor.u32 %v723_v60, %v617_v59 }
  0x10   :  { %261 = vmatpush.bf16.msra.mxu0 %v650_v44  ;;  %v724_v1 = vld [vmem:[%s1151_s1 + $0x54] sm:$0xf0]  ;;  %v722_v2 = vld [vmem:[%s1151_s1 + $0x4c] sm:$0xf]  ;;  %v627_v3 = vld [vmem:[%s1151_s1 + $0x58] sm:$0xf0]  ;;  %v622_v5 = vor.u32 %v721_v61, %v619_v63 }
  0x11   :  { %280 = vmatpush.bf16.msra.mxu1 %v654_v45  ;;  %299 = vmatpush.bf16.msra.mxu2 %v658_v46  ;;  %v626_v6 = vor.u32 %v724_v1, %v625_v0  ;;  %v601_v7 = vld [vmem:[%s1151_s1 + $0x20] sm:$0xf]  ;;  %v719_v8 = vld [vmem:[%s1151_s1 + $0x2c] sm:$0xf0]  ;;  %v717_v9 = vld [vmem:[%s1151_s1 + $0x24] sm:$0xf]  ;;  %v630_v10 = vor.u32 %v722_v2, %v627_v3 }
  0x12   :  { %318 = vmatpush.bf16.msra.mxu3 %v662_v50  ;;  %v603_v11 = vld [vmem:[%s1151_s1 + $0x30] sm:$0xf0]  ;;  %v609_v12 = vld [vmem:[%s1151_s1 + $0x28] sm:$0xf]  ;;  %v720_v13 = vld [vmem:[%s1151_s1 + $0x34] sm:$0xf0]  ;;  %v602_v16 = vor.u32 %v719_v8, %v601_v7 }
  0x13   :  { %v718_v14 = vld [vmem:[%s1151_s1 + $0x2c] sm:$0xf]  ;;  %v611_v15 = vld [vmem:[%s1151_s1 + $0x38] sm:$0xf0]  ;;  %v606_v17 = vor.u32 %v717_v9, %v603_v11  ;;  %v610_v18 = vor.u32 %v720_v13, %v609_v12  ;;  %v585_v19 = vld [vmem:[%s1151_s1] sm:$0xf] }
  0x14   :  { %262 = vmatpush.bf16.msra.mxu0 %v634_v56  ;;  %v715_v20 = vld [vmem:[%s1151_s1 + $0xc] sm:$0xf0]  ;;  %v713_v21 = vld [vmem:[%s1151_s1 + $0x4] sm:$0xf]  ;;  %v614_v22 = vor.u32 %v718_v14, %v611_v15  ;;  %v587_v23 = vld [vmem:[%s1151_s1 + $0x10] sm:$0xf0] }
  0x15   :  { %281 = vmatpush.bf16.msra.mxu1 %v638_v57  ;;  %300 = vmatpush.bf16.msra.mxu2 %v642_v58  ;;  %v593_v24 = vld [vmem:[%s1151_s1 + $0x8] sm:$0xf]  ;;  %v716_v25 = vld [vmem:[%s1151_s1 + $0x14] sm:$0xf0]  ;;  %v714_v26 = vld [vmem:[%s1151_s1 + $0xc] sm:$0xf]  ;;  %v586_v28 = vor.u32 %v715_v20, %v585_v19  ;;  %v590_v29 = vor.u32 %v713_v21, %v587_v23 }
  0x16   :  { %319 = vmatpush.bf16.msra.mxu3 %v646_v62  ;;  %v595_v27 = vld [vmem:[%s1151_s1 + $0x18] sm:$0xf0]  ;;  %v594_v30 = vor.u32 %v716_v25, %v593_v24  ;;  %v711_v32 = vld [vmem:[%s1152_s0] sm:$0xff]  ;;  %v712_v33 = vld [vmem:[%s1152_s0 + $0x8] sm:$0xff] }
  0x17   :  { %v598_v31 = vor.u32 %v714_v26, %v595_v27  ;;  %v385_v34 = vld [vmem:[%s1153_s2] sm:$0xf] }
  0x18   :  { %263 = vmatpush.bf16.msra.mxu0 %v618_v4  ;;  %v998_v35 = vperm.slane %v385_v34, 0  ;;  %v1000_v36 = vperm.slane %v385_v34, 1  ;;  %v1012_v43 = vperm.slane %v385_v34, 2  ;;  %v1015_v45 = vperm.slane %v385_v34, 3 }
  0x19   :  { %282 = vmatpush.bf16.msra.mxu1 %v622_v5  ;;  %301 = vmatpush.bf16.msra.mxu2 %v626_v6 }
  0x1a   :  { %320 = vmatpush.bf16.msra.mxu3 %v630_v10 }
  0x1c   :  { %264 = vmatpush.bf16.msra.mxu0 %v602_v16 }
  0x1d   :  { %283 = vmatpush.bf16.msra.mxu1 %v606_v17  ;;  %302 = vmatpush.bf16.msra.mxu2 %v610_v18 }
  0x1e   :  { %321 = vmatpush.bf16.msra.mxu3 %v614_v22 }
  0x20   :  { %265 = vmatpush.bf16.msra.mxu0 %v586_v28 }
  0x21   :  { %284 = vmatpush.bf16.msra.mxu1 %v590_v29  ;;  %303 = vmatpush.bf16.msra.mxu2 %v594_v30 }
  0x22   :  { %322 = vmatpush.bf16.msra.mxu3 %v598_v31 }
  0x23   :  { %266 = vmatmul.bf16.vlgmr.msra.gmra.mxu0 %v711_v32 }
  0x24   :  { %285 = vmatmul.bf16.vlgmr.msra.gmra.mxu1 %v711_v32  ;;  %304 = vmatmul.bf16.vlgmr.msra.gmra.mxu2 %v711_v32 }
  0x25   :  { %323 = vmatmul.bf16.vlgmr.msra.gmra.mxu3 %v711_v32 }
  0x33   :  { %271 = vmatmul.bf16.gmra.mxu0 %v712_v33 }
  0x34   :  { %290 = vmatmul.bf16.gmra.mxu1 %v712_v33  ;;  %309 = vmatmul.bf16.gmra.mxu2 %v712_v33 }
  0x35   :  { %328 = vmatmul.bf16.gmra.mxu3 %v712_v33 }
  0xa0   :  { %v267_v37 = vpop.f32.mrf.mxu0 }
  0xa1   :  { %v1003_v38 = vadd.f32 %v998_v35, %v267_v37  ;;  %v286_v39 = vpop.f32.mrf.mxu1 }
  0xa2   :  { %v1006_v40 = vadd.f32 %v1000_v36, %v286_v39 }
  0xa3   :  { %v411_v41 = vmul.f32 %v1003_v38, %v1003_v38 }
  0xa4   :  { %v412_v42 = vmul.f32 %v1006_v40, %v1006_v40 }
  0xa5   :  { %v427_v44 = vmul.f32 %v411_v41, %v1003_v38 }
  0xa6   :  { %v428_v46 = vmul.f32 %v412_v42, %v1006_v40 }
  0xa7   :  { %v443_v47 = vmul.f32 0.044715, %v427_v44  ;;  %v305_v48 = vpop.f32.mrf.mxu2 }
  0xa8   :  { %v444_v49 = vmul.f32 0.044715, %v428_v46  ;;  %v1019_v50 = vadd.f32 %v1012_v43, %v305_v48  ;;  %v324_v51 = vpop.f32.mrf.mxu3  ;;  %v269_v52 = vpop.f32.mrf.mxu0 }
  0xa9   :  { %v459_v53 = vadd.f32 %v443_v47, %v1003_v38  ;;  %v1023_v54 = vadd.f32 %v1015_v45, %v324_v51  ;;  %v1026_v55 = vadd.f32 %v998_v35, %v269_v52  ;;  %v288_v56 = vpop.f32.mrf.mxu1 }
  0xaa   :  { %v460_v57 = vadd.f32 %v444_v49, %v1006_v40  ;;  %v413_v58 = vmul.f32 %v1019_v50, %v1019_v50  ;;  %v1032_v59 = vadd.f32 %v1000_v36, %v288_v56 }
  0xab   :  { %v475_v60 = vmul.f32 0.7978846, %v459_v53  ;;  %v414_v61 = vmul.f32 %v1023_v54, %v1023_v54  ;;  %v415_v62 = vmul.f32 %v1026_v55, %v1026_v55 }
  0xac   :  { %v476_v63 = vmul.f32 0.7978846, %v460_v57  ;;  %v429_v0 = vmul.f32 %v413_v58, %v1019_v50  ;;  %v416_v1 = vmul.f32 %v1032_v59, %v1032_v59 }
  0xad   :  { %745 = vtanh.f32 %v475_v60  ;;  %v430_v2 = vmul.f32 %v414_v61, %v1023_v54  ;;  %v431_v3 = vmul.f32 %v415_v62, %v1026_v55 }
  0xae   :  { %747 = vtanh.f32 %v476_v63  ;;  %v445_v4 = vmul.f32 0.044715, %v429_v0  ;;  %v432_v5 = vmul.f32 %v416_v1, %v1032_v59 }
  0xaf   :  { %v446_v6 = vmul.f32 0.044715, %v430_v2  ;;  %v447_v7 = vmul.f32 0.044715, %v431_v3  ;;  %v307_v8 = vpop.f32.mrf.mxu2 }
  0xb0   :  { %v461_v9 = vadd.f32 %v445_v4, %v1019_v50  ;;  %v448_v10 = vmul.f32 0.044715, %v432_v5  ;;  %v1046_v11 = vadd.f32 %v1012_v43, %v307_v8  ;;  %v326_v12 = vpop.f32.mrf.mxu3  ;;  %v272_v13 = vpop.f32.mrf.mxu0 }
  0xb1   :  { %v462_v14 = vadd.f32 %v446_v6, %v1023_v54  ;;  %v463_v15 = vadd.f32 %v447_v7, %v1026_v55  ;;  %v1051_v16 = vadd.f32 %v1015_v45, %v326_v12  ;;  %v1054_v17 = vadd.f32 %v998_v35, %v272_v13  ;;  %v291_v18 = vpop.f32.mrf.mxu1 }
  0xb2   :  { %v477_v19 = vmul.f32 0.7978846, %v461_v9  ;;  %v464_v20 = vadd.f32 %v448_v10, %v1032_v59  ;;  %v417_v21 = vmul.f32 %v1046_v11, %v1046_v11  ;;  %v1060_v22 = vadd.f32 %v1000_v36, %v291_v18 }
  0xb3   :  { %v746_v23 = vpop.eup %745  ;;  %v478_v24 = vmul.f32 0.7978846, %v462_v14  ;;  %v479_v25 = vmul.f32 0.7978846, %v463_v15  ;;  %v418_v26 = vmul.f32 %v1051_v16, %v1051_v16  ;;  %v419_v27 = vmul.f32 %v1054_v17, %v1054_v17 }
  0xb4   :  { %v748_v28 = vpop.eup %747  ;;  %v507_v29 = vadd.f32 1.0, %v746_v23  ;;  %749 = vtanh.f32 %v477_v19  ;;  %v480_v30 = vmul.f32 0.7978846, %v464_v20  ;;  %v433_v31 = vmul.f32 %v417_v21, %v1046_v11 }
  0xb5   :  { %v508_v32 = vadd.f32 1.0, %v748_v28  ;;  %751 = vtanh.f32 %v478_v24  ;;  %v434_v33 = vmul.f32 %v418_v26, %v1051_v16  ;;  %v435_v34 = vmul.f32 %v419_v27, %v1054_v17 }
  0xb6   :  { %v523_v37 = vmul.f32 0.5, %v507_v29  ;;  %753 = vtanh.f32 %v479_v25  ;;  %v449_v39 = vmul.f32 0.044715, %v433_v31  ;;  %v420_v41 = vmul.f32 %v1060_v22, %v1060_v22 }
  0xb7   :  { %v524_v42 = vmul.f32 0.5, %v508_v32  ;;  %755 = vtanh.f32 %v480_v30  ;;  %v450_v44 = vmul.f32 0.044715, %v434_v33  ;;  %v451_v46 = vmul.f32 0.044715, %v435_v34  ;;  %v310_v47 = vpop.f32.mrf.mxu2 }
  0xb8   :  { %v539_v48 = vmul.f32 %v523_v37, %v1003_v38  ;;  %v465_v49 = vadd.f32 %v449_v39, %v1046_v11  ;;  %v436_v51 = vmul.f32 %v420_v41, %v1060_v22  ;;  %v1075_v52 = vadd.f32 %v1012_v43, %v310_v47  ;;  %v329_v53 = vpop.f32.mrf.mxu3  ;;  %v274_v56 = vpop.f32.mrf.mxu0 }
  0xb9   :  { %v540_v57 = vmul.f32 %v524_v42, %v1006_v40  ;;  %v466_v58 = vadd.f32 %v450_v44, %v1051_v16  ;;  %v467_v60 = vadd.f32 %v451_v46, %v1054_v17  ;;  %v1081_v61 = vadd.f32 %v1015_v45, %v329_v53  ;;  %v293_v19 = vpop.f32.mrf.mxu1 }
  0xba   :  { %v750_v62 = vpop.eup %749  ;;  %v481_v38 = vmul.f32 0.7978846, %v465_v49  ;;  %v452_v63 = vmul.f32 0.044715, %v436_v51  ;;  %v421_v0 = vmul.f32 %v1075_v52, %v1075_v52  ;;  %v1086_v1 = vadd.f32 %v998_v35, %v274_v56 }
  0xbb   :  { %v752_v2 = vpop.eup %751  ;;  %v555_v3 = vpack.c.bf16 %v540_v57, %v539_v48  ;;  %v509_v4 = vadd.f32 1.0, %v750_v62  ;;  %v482_v40 = vmul.f32 0.7978846, %v466_v58  ;;  %v483_v5 = vmul.f32 0.7978846, %v467_v60 }
  0xbc   :  { %v754_v6 = vpop.eup %753  ;;  %v510_v7 = vadd.f32 1.0, %v752_v2  ;;  %757 = vtanh.f32 %v481_v38  ;;  %v468_v8 = vadd.f32 %v452_v63, %v1060_v22  ;;  %v437_v9 = vmul.f32 %v421_v0, %v1075_v52 }
  0xbd   :  { %v756_v10 = vpop.eup %755  ;;  %563 = vst [vmem:[%s1154_s3] sm:$0xff] %v555_v3  ;;  %v525_v12 = vmul.f32 0.5, %v509_v4  ;;  %v511_v35 = vadd.f32 1.0, %v754_v6  ;;  %759 = vtanh.f32 %v482_v40  ;;  %v422_v13 = vmul.f32 %v1081_v61, %v1081_v61 }
  0xbe   :  { %v526_v14 = vmul.f32 0.5, %v510_v7  ;;  %v512_v15 = vadd.f32 1.0, %v756_v10  ;;  %761 = vtanh.f32 %v483_v5  ;;  %v484_v18 = vmul.f32 0.7978846, %v468_v8 }
  0xbf   :  { %v541_v20 = vmul.f32 %v525_v12, %v1019_v50  ;;  %v527_v21 = vmul.f32 0.5, %v511_v35  ;;  %v453_v23 = vmul.f32 0.044715, %v437_v9  ;;  %v438_v24 = vmul.f32 %v422_v13, %v1081_v61  ;;  %v312_v25 = vpop.f32.mrf.mxu2 }
  0xc0   :  { %v542_v26 = vmul.f32 %v526_v14, %v1023_v54  ;;  %v528_v27 = vmul.f32 0.5, %v512_v15  ;;  %763 = vtanh.f32 %v484_v18  ;;  %v423_v28 = vmul.f32 %v1086_v1, %v1086_v1  ;;  %v331_v62 = vpop.f32.mrf.mxu3 }
  0xc1   :  { %v543_v29 = vmul.f32 %v527_v21, %v1026_v55  ;;  %v469_v30 = vadd.f32 %v453_v23, %v1075_v52  ;;  %v454_v31 = vmul.f32 0.044715, %v438_v24  ;;  %v1103_v32 = vadd.f32 %v1000_v36, %v293_v19 }
  0xc2   :  { %v758_v50 = vpop.eup %757  ;;  %v556_v33 = vpack.c.bf16 %v542_v26, %v541_v20  ;;  %v544_v34 = vmul.f32 %v528_v27, %v1032_v59  ;;  %v439_v37 = vmul.f32 %v423_v28, %v1086_v1  ;;  %v1108_v54 = vadd.f32 %v1012_v43, %v312_v25 }
  0xc3   :  { %v760_v39 = vpop.eup %759  ;;  %v513_v41 = vadd.f32 1.0, %v758_v50  ;;  %v485_v42 = vmul.f32 0.7978846, %v469_v30  ;;  %v470_v55 = vadd.f32 %v454_v31, %v1081_v61  ;;  %v424_v44 = vmul.f32 %v1103_v32, %v1103_v32 }
  0xc4   :  { %v762_v46 = vpop.eup %761  ;;  %564 = vst [vmem:[%s1154_s3 + $0x8] sm:$0xff] %v556_v33  ;;  %v557_v36 = vpack.c.bf16 %v544_v34, %v543_v29  ;;  %v514_v59 = vadd.f32 1.0, %v760_v39  ;;  %v455_v47 = vmul.f32 0.044715, %v439_v37  ;;  %v425_v43 = vmul.f32 %v1108_v54, %v1108_v54 }
  0xc5   :  { %v529_v48 = vmul.f32 0.5, %v513_v41  ;;  %v515_v49 = vadd.f32 1.0, %v762_v46  ;;  %765 = vtanh.f32 %v485_v42  ;;  %v486_v51 = vmul.f32 0.7978846, %v470_v55 }
  0xc6   :  { %v764_v53 = vpop.eup %763  ;;  %565 = vst [vmem:[%s1154_s3 + $0x10] sm:$0xff] %v557_v36  ;;  %v530_v56 = vmul.f32 0.5, %v514_v59  ;;  %v471_v57 = vadd.f32 %v455_v47, %v1086_v1  ;;  %v440_v58 = vmul.f32 %v424_v44, %v1103_v32  ;;  %v441_v60 = vmul.f32 %v425_v43, %v1108_v54 }
  0xc7   :  { %v545_v38 = vmul.f32 %v529_v48, %v1046_v11  ;;  %v531_v63 = vmul.f32 0.5, %v515_v49  ;;  %v516_v0 = vadd.f32 1.0, %v764_v53  ;;  %767 = vtanh.f32 %v486_v51 }
  0xc8   :  { %v546_v2 = vmul.f32 %v530_v56, %v1051_v16  ;;  %v487_v3 = vmul.f32 0.7978846, %v471_v57  ;;  %v456_v4 = vmul.f32 0.044715, %v440_v58  ;;  %v457_v40 = vmul.f32 0.044715, %v441_v60 }
  0xc9   :  { %v547_v5 = vmul.f32 %v531_v63, %v1054_v17  ;;  %v532_v6 = vmul.f32 0.5, %v516_v0  ;;  %v410_v7 = vadd.f32 %v1015_v45, %v331_v62 }
  0xca   :  { %v558_v8 = vpack.c.bf16 %v546_v2, %v545_v38  ;;  %769 = vtanh.f32 %v487_v3  ;;  %v472_v9 = vadd.f32 %v456_v4, %v1103_v32  ;;  %v473_v10 = vadd.f32 %v457_v40, %v1108_v54 }
  0xcb   :  { %v766_v11 = vpop.eup %765  ;;  %v548_v12 = vmul.f32 %v532_v6, %v1060_v22  ;;  %v426_v35 = vmul.f32 %v410_v7, %v410_v7 }
  0xcc   :  { %566 = vst [vmem:[%s1154_s3 + $0x18] sm:$0xff] %v558_v8  ;;  %v517_v16 = vadd.f32 1.0, %v766_v11  ;;  %v488_v13 = vmul.f32 0.7978846, %v472_v9  ;;  %v489_v17 = vmul.f32 0.7978846, %v473_v10 }
  0xcd   :  { %v768_v14 = vpop.eup %767  ;;  %v559_v15 = vpack.c.bf16 %v548_v12, %v547_v5  ;;  %v442_v45 = vmul.f32 %v426_v35, %v410_v7 }
  0xce   :  { %v533_v18 = vmul.f32 0.5, %v517_v16  ;;  %v518_v19 = vadd.f32 1.0, %v768_v14  ;;  %771 = vtanh.f32 %v488_v13 }
  0xcf   :  { %567 = vst [vmem:[%s1154_s3 + $0x20] sm:$0xff] %v559_v15  ;;  %773 = vtanh.f32 %v489_v17  ;;  %v458_v22 = vmul.f32 0.044715, %v442_v45 }
  0xd0   :  { %v770_v20 = vpop.eup %769  ;;  %v549_v21 = vmul.f32 %v533_v18, %v1075_v52  ;;  %v534_v23 = vmul.f32 0.5, %v518_v19 }
  0xd1   :  { %v519_v24 = vadd.f32 1.0, %v770_v20  ;;  %v474_v25 = vadd.f32 %v458_v22, %v410_v7 }
  0xd2   :  { %v550_v26 = vmul.f32 %v534_v23, %v1081_v61 }
  0xd3   :  { %v535_v27 = vmul.f32 0.5, %v519_v24  ;;  %v490_v28 = vmul.f32 0.7978846, %v474_v25 }
  0xd4   :  { %v772_v29 = vpop.eup %771  ;;  %v560_v30 = vpack.c.bf16 %v550_v26, %v549_v21 }
  0xd5   :  { %v774_v31 = vpop.eup %773  ;;  %v520_v50 = vadd.f32 1.0, %v772_v29  ;;  %775 = vtanh.f32 %v490_v28  ;;  %v551_v34 = vmul.f32 %v535_v27, %v1086_v1 }
  0xd6   :  { %568 = vst [vmem:[%s1154_s3 + $0x28] sm:$0xff] %v560_v30  ;;  %v521_v33 = vadd.f32 1.0, %v774_v31 }
  0xd7   :  { %v536_v52 = vmul.f32 0.5, %v520_v50 }
  0xd8   :  { %v537_v39 = vmul.f32 0.5, %v521_v33 }
  0xd9   :  { %v552_v37 = vmul.f32 %v536_v52, %v1103_v32 }
  0xda   :  { %v553_v55 = vmul.f32 %v537_v39, %v1108_v54 }
  0xdb   :  { %v776_v41 = vpop.eup %775  ;;  %v561_v61 = vpack.c.bf16 %v552_v37, %v551_v34 }
  0xdc   :  { %v522_v42 = vadd.f32 1.0, %v776_v41 }
  0xdd   :  { %569 = vst [vmem:[%s1154_s3 + $0x30] sm:$0xff] %v561_v61 }
  0xde   :  { %v538_v44 = vmul.f32 0.5, %v522_v42 }
  0xe0   :  { %v554_v46 = vmul.f32 %v538_v44, %v410_v7 }
  0xe2   :  { %v562_v36 = vpack.c.bf16 %v554_v46, %v553_v55 }
  0xe4   :  { %570 = vst [vmem:[%s1154_s3 + $0x38] sm:$0xff] %v562_v36 }

// kernel: glm_for_multi_token_cloze.8
= control target key start
LH: loop header
LB: loop body
LE: loop exit
PB: predicated region body
PF: predicated region fallthrough
CT: control target
= control target key end

     0   :  { %s826_s1 = inlined_call_operand.vmem [shape: bf16[512,128], index: 1, kind: input, shape index: {}]   ;;  %s827_s0 = inlined_call_operand.vmem [shape: bf16[32,512], index: 0, kind: input, shape index: {}]   ;;  %s828_s2 = inlined_call_operand.vmem [shape: f32[1,128], index: 2, kind: input, shape index: {}]   ;;  %s829_s3 = inlined_call_operand.vmem [shape: bf16[32,128], index: 3, kind: output, shape index: {}]  }
   0x1   :  { %v616_v0 = vld [vmem:[%s826_s1 + $0x38] sm:$0xff]  ;;  %v615_v4 = vld [vmem:[%s826_s1 + $0x30] sm:$0xff]  ;;  %v614_v8 = vld [vmem:[%s826_s1 + $0x28] sm:$0xff] }
   0x2   :  { %v624_v1 = vld [vmem:[%s826_s1 + $0x78] sm:$0xff]  ;;  %330 = vmatpush.bf16.msra.mxu0 %v616_v0  ;;  %v623_v5 = vld [vmem:[%s826_s1 + $0x70] sm:$0xff]  ;;  %v622_v9 = vld [vmem:[%s826_s1 + $0x68] sm:$0xff] }
   0x3   :  { %v632_v2 = vld [vmem:[%s826_s1 + $0xb8] sm:$0xff]  ;;  %349 = vmatpush.bf16.msra.mxu1 %v624_v1  ;;  %v631_v6 = vld [vmem:[%s826_s1 + $0xb0] sm:$0xff]  ;;  %v630_v10 = vld [vmem:[%s826_s1 + $0xa8] sm:$0xff] }
   0x4   :  { %v640_v3 = vld [vmem:[%s826_s1 + $0xf8] sm:$0xff]  ;;  %368 = vmatpush.bf16.msra.mxu2 %v632_v2  ;;  %v639_v7 = vld [vmem:[%s826_s1 + $0xf0] sm:$0xff]  ;;  %v638_v11 = vld [vmem:[%s826_s1 + $0xe8] sm:$0xff] }
   0x5   :  { %387 = vmatpush.bf16.msra.mxu3 %v640_v3  ;;  %v613_v12 = vld [vmem:[%s826_s1 + $0x20] sm:$0xff]  ;;  %v612_v16 = vld [vmem:[%s826_s1 + $0x18] sm:$0xff]  ;;  %v611_v20 = vld [vmem:[%s826_s1 + $0x10] sm:$0xff] }
   0x6   :  { %331 = vmatpush.bf16.msra.mxu0 %v615_v4  ;;  %v621_v13 = vld [vmem:[%s826_s1 + $0x60] sm:$0xff]  ;;  %v620_v17 = vld [vmem:[%s826_s1 + $0x58] sm:$0xff]  ;;  %v619_v21 = vld [vmem:[%s826_s1 + $0x50] sm:$0xff] }
   0x7   :  { %350 = vmatpush.bf16.msra.mxu1 %v623_v5  ;;  %v629_v14 = vld [vmem:[%s826_s1 + $0xa0] sm:$0xff]  ;;  %v628_v18 = vld [vmem:[%s826_s1 + $0x98] sm:$0xff]  ;;  %v627_v22 = vld [vmem:[%s826_s1 + $0x90] sm:$0xff] }
   0x8   :  { %369 = vmatpush.bf16.msra.mxu2 %v631_v6  ;;  %v637_v15 = vld [vmem:[%s826_s1 + $0xe0] sm:$0xff]  ;;  %v636_v19 = vld [vmem:[%s826_s1 + $0xd8] sm:$0xff]  ;;  %v635_v23 = vld [vmem:[%s826_s1 + $0xd0] sm:$0xff] }
   0x9   :  { %388 = vmatpush.bf16.msra.mxu3 %v639_v7  ;;  %v610_v24 = vld [vmem:[%s826_s1 + $0x8] sm:$0xff]  ;;  %v609_v28 = vld [vmem:[%s826_s1] sm:$0xff]  ;;  %v603_v33 = vld [vmem:[%s827_s0 + $0xc] sm:$0xf0] }
   0xa   :  { %332 = vmatpush.bf16.msra.mxu0 %v614_v8  ;;  %v618_v25 = vld [vmem:[%s826_s1 + $0x48] sm:$0xff]  ;;  %v617_v29 = vld [vmem:[%s826_s1 + $0x40] sm:$0xff]  ;;  %v445_v35 = vld [vmem:[%s827_s0 + $0x10] sm:$0xf0] }
   0xb   :  { %351 = vmatpush.bf16.msra.mxu1 %v622_v9  ;;  %v626_v26 = vld [vmem:[%s826_s1 + $0x88] sm:$0xff]  ;;  %v625_v30 = vld [vmem:[%s826_s1 + $0x80] sm:$0xff]  ;;  %v604_v37 = vld [vmem:[%s827_s0 + $0x14] sm:$0xf0] }
   0xc   :  { %370 = vmatpush.bf16.msra.mxu2 %v630_v10  ;;  %v634_v27 = vld [vmem:[%s826_s1 + $0xc8] sm:$0xff]  ;;  %v633_v31 = vld [vmem:[%s826_s1 + $0xc0] sm:$0xff]  ;;  %v453_v39 = vld [vmem:[%s827_s0 + $0x18] sm:$0xf0] }
   0xd   :  { %389 = vmatpush.bf16.msra.mxu3 %v638_v11  ;;  %v443_v32 = vld [vmem:[%s827_s0] sm:$0xf]  ;;  %v601_v34 = vld [vmem:[%s827_s0 + $0x4] sm:$0xf]  ;;  %v451_v36 = vld [vmem:[%s827_s0 + $0x8] sm:$0xf] }
   0xe   :  { %333 = vmatpush.bf16.msra.mxu0 %v613_v12  ;;  %v602_v38 = vld [vmem:[%s827_s0 + $0xc] sm:$0xf]  ;;  %v444_v40 = vor.u32 %v603_v33, %v443_v32  ;;  %v448_v41 = vor.u32 %v601_v34, %v445_v35  ;;  %v452_v42 = vor.u32 %v604_v37, %v451_v36  ;;  %v459_v44 = vld [vmem:[%s827_s0 + $0x20] sm:$0xf]  ;;  %v607_v45 = vld [vmem:[%s827_s0 + $0x2c] sm:$0xf0] }
   0xf   :  { %352 = vmatpush.bf16.msra.mxu1 %v621_v13  ;;  %v456_v43 = vor.u32 %v602_v38, %v453_v39  ;;  %v605_v46 = vld [vmem:[%s827_s0 + $0x24] sm:$0xf]  ;;  %v461_v47 = vld [vmem:[%s827_s0 + $0x30] sm:$0xf0]  ;;  %v467_v48 = vld [vmem:[%s827_s0 + $0x28] sm:$0xf]  ;;  %v460_v52 = vor.u32 %v607_v45, %v459_v44 }
  0x10   :  { %371 = vmatpush.bf16.msra.mxu2 %v629_v14  ;;  %v608_v49 = vld [vmem:[%s827_s0 + $0x34] sm:$0xf0]  ;;  %v606_v50 = vld [vmem:[%s827_s0 + $0x2c] sm:$0xf]  ;;  %v469_v51 = vld [vmem:[%s827_s0 + $0x38] sm:$0xf0]  ;;  %v464_v53 = vor.u32 %v605_v46, %v461_v47 }
  0x11   :  { %390 = vmatpush.bf16.msra.mxu3 %v637_v15  ;;  %v468_v54 = vor.u32 %v608_v49, %v467_v48  ;;  %v472_v55 = vor.u32 %v606_v50, %v469_v51  ;;  %v652_v4 = vld [vmem:[%s828_s2] ss:$0 sm:$0xff] }
  0x12   :  { %334 = vmatpush.bf16.msra.mxu0 %v612_v16 }
  0x13   :  { %353 = vmatpush.bf16.msra.mxu1 %v620_v17 }
  0x14   :  { %372 = vmatpush.bf16.msra.mxu2 %v628_v18 }
  0x15   :  { %391 = vmatpush.bf16.msra.mxu3 %v636_v19 }
  0x16   :  { %335 = vmatpush.bf16.msra.mxu0 %v611_v20 }
  0x17   :  { %354 = vmatpush.bf16.msra.mxu1 %v619_v21 }
  0x18   :  { %373 = vmatpush.bf16.msra.mxu2 %v627_v22 }
  0x19   :  { %392 = vmatpush.bf16.msra.mxu3 %v635_v23 }
  0x1a   :  { %336 = vmatpush.bf16.msra.mxu0 %v610_v24 }
  0x1b   :  { %355 = vmatpush.bf16.msra.mxu1 %v618_v25 }
  0x1c   :  { %374 = vmatpush.bf16.msra.mxu2 %v626_v26 }
  0x1d   :  { %393 = vmatpush.bf16.msra.mxu3 %v634_v27 }
  0x1e   :  { %337 = vmatpush.bf16.msra.mxu0 %v609_v28 }
  0x1f   :  { %356 = vmatpush.bf16.msra.mxu1 %v617_v29 }
  0x20   :  { %375 = vmatpush.bf16.msra.mxu2 %v625_v30 }
  0x21   :  { %394 = vmatpush.bf16.msra.mxu3 %v633_v31  ;;  %338 = vmatmul.bf16.vlgmr.msra.gmra.mxu0 %v444_v40 }
  0x22   :  { %357 = vmatmul.bf16.vlgmr.msra.gmra.mxu1 %v448_v41 }
  0x23   :  { %376 = vmatmul.bf16.vlgmr.msra.gmra.mxu2 %v452_v42 }
  0x24   :  { %395 = vmatmul.bf16.vlgmr.msra.gmra.mxu3 %v456_v43 }
  0x31   :  { %343 = vmatmul.bf16.gmra.mxu0 %v460_v52 }
  0x32   :  { %362 = vmatmul.bf16.gmra.mxu1 %v464_v53 }
  0x33   :  { %381 = vmatmul.bf16.gmra.mxu2 %v468_v54 }
  0x34   :  { %400 = vmatmul.bf16.gmra.mxu3 %v472_v55 }
  0x9e   :  { %v339_v56 = vpop.f32.mrf.mxu0 }
  0x9f   :  { %v358_v57 = vpop.f32.mrf.mxu1 }
  0xa0   :  { %v359_v60 = vadd.f32 %v358_v57, %v339_v56 }
  0xa6   :  { %v377_v58 = vpop.f32.mrf.mxu2  ;;  %v341_v61 = vpop.f32.mrf.mxu0 }
  0xa7   :  { %v396_v59 = vpop.f32.mrf.mxu3  ;;  %v360_v62 = vpop.f32.mrf.mxu1  ;;  %v378_v63 = vadd.f32 %v377_v58, %v359_v60 }
  0xa8   :  { %v361_v0 = vadd.f32 %v360_v62, %v341_v61 }
  0xa9   :  { %v397_v3 = vadd.f32 %v396_v59, %v378_v63 }
  0xab   :  { %v425_v9 = vadd.f32 %v652_v4, %v397_v3 }
  0xae   :  { %v379_v1 = vpop.f32.mrf.mxu2  ;;  %v344_v6 = vpop.f32.mrf.mxu0 }
  0xaf   :  { %v398_v2 = vpop.f32.mrf.mxu3  ;;  %v380_v5 = vadd.f32 %v379_v1, %v361_v0  ;;  %v363_v7 = vpop.f32.mrf.mxu1 }
  0xb0   :  { %v364_v14 = vadd.f32 %v363_v7, %v344_v6 }
  0xb1   :  { %v399_v8 = vadd.f32 %v398_v2, %v380_v5 }
  0xb3   :  { %v426_v10 = vadd.f32 %v652_v4, %v399_v8 }
  0xb5   :  { %v644_v11 = vpack.c.bf16 %v426_v10, %v425_v9 }
  0xb6   :  { %v382_v12 = vpop.f32.mrf.mxu2  ;;  %v346_v15 = vpop.f32.mrf.mxu0 }
  0xb7   :  { %v401_v13 = vpop.f32.mrf.mxu3  ;;  %645 = vst [vmem:[%s829_s3] sm:$0xff] %v644_v11   ;;  %v365_v16 = vpop.f32.mrf.mxu1  ;;  %v383_v17 = vadd.f32 %v382_v12, %v364_v14 }
  0xb8   :  { %v366_v18 = vadd.f32 %v365_v16, %v346_v15 }
  0xb9   :  { %v402_v20 = vadd.f32 %v401_v13, %v383_v17 }
  0xbb   :  { %v427_v24 = vadd.f32 %v652_v4, %v402_v20 }
  0xbe   :  { %v384_v19 = vpop.f32.mrf.mxu2 }
  0xbf   :  { %v385_v21 = vadd.f32 %v384_v19, %v366_v18  ;;  %v403_v22 = vpop.f32.mrf.mxu3 }
  0xc1   :  { %v404_v23 = vadd.f32 %v403_v22, %v385_v21 }
  0xc3   :  { %v428_v25 = vadd.f32 %v652_v4, %v404_v23 }
  0xc5   :  { %v649_v26 = vpack.c.bf16 %v428_v25, %v427_v24 }
  0xc7   :  { %651 = vst [vmem:[%s829_s3 + $0x8] sm:$0xff] %v649_v26  }

// kernel: glm_for_multi_token_cloze.9
= control target key start
LH: loop header
LB: loop body
LE: loop exit
PB: predicated region body
PF: predicated region fallthrough
CT: control target
= control target key end

     0   :  { %s1127_s15 = smov 0   ;;  %s1129_s16 = smov 0   ;;  %s1325_s0 = inlined_call_operand.vmem [shape: s32[32,1], index: 0, kind: input, shape index: {}]   ;;  %s1326_s1 = inlined_call_operand.vmem [shape: f32[32,1], index: 1, kind: input, shape index: {}]   ;;  %s1327_s2 = inlined_call_operand.vmem [shape: bf16[32,128], index: 2, kind: input, shape index: {}]   ;;  %s1328_s3 = inlined_call_operand.vmem [shape: bf16[128,512], index: 3, kind: input, shape index: {}]   ;;  %s1329_s4 = inlined_call_operand.vmem [shape: f32[32,1], index: 4, kind: output, shape index: {}]  }
   0x1   :  { %s1131_s17 = smov 0   ;;  %s1133_s18 = smov 0  }
   0x2   :  { %s1135_s19 = smov 0  }
   0x3 LB: > { %s23_s20 = sadd.s32 1, %s1091_s18  ;;  %p118_p1 = scmp.ne.s32.totalorder %s1083_s16, %s1079_s15  ;;  %s1095_s19 = sphi %s1135_s19, %s14_s19   ;;  %s1091_s18 = sphi %s1133_s18, %s1333_s18   ;;  %s1087_s17 = sphi %s1131_s17, %s1332_s17   ;;  %s1083_s16 = sphi %s1129_s16, %s1331_s16   ;;  %s1079_s15 = sphi %s1127_s15, %s1330_s15  }
   0x4   : > { %p24_p0 = scmp.ge.s32.totalorder %s23_s20, 4  ;;  %p119_p2 = scmp.eq.s32.totalorder %s1095_s19, 0 }
   0x5   : > { %s111_s22 = sadd.s32 1, %s1083_s16  ;;  %p893_p5 = scmp.ge.s32.totalorder %s1095_s19, 4 }
   0x6   : > { %s1335_s20 = smov (%p24_p0, %s23_s20), 0  ;;  %p120_p3 = por %p119_p2, %p118_p1 }
   0x7   : > { %s108_s21 = ssub.s32 %s1091_s18, %s1335_s20  ;;  %197 = sbr.rel (%p893_p5) target bundleno = 32 (0x20), region = 28 }
   0x8   : > { %p109_p4 = scmp.eq.s32.totalorder %s108_s21, 0 }
   0xa   : > { %s1162_s23 = scalar_select %p109_p4, %s1083_s16, %s111_s22  }
   0xc   : > { %200 = sbr.rel (!%p120_p3) target bundleno = 32 (0x20), region = 32  ;;  %s202_s24 = sand.u32 (%p120_p3), 1, %s1083_s16  }
   0xd   : > { %s895_s25 = sshll.u32 (%p120_p3), %s1091_s18, 2  ;;  %s894_s26 = sshll.u32 (%p120_p3), %s202_s24, 6 }
   0xe   : > { %s1170_s29 = scalar_lea.vmem (%p120_p3), %s1328_s3, %s895_s25  ;;  %s204_s30 = scalar_lea.vmem (%p120_p3), [#allocation5], %s894_s26 }
   0xf   : > { %v223_v0 = vld [vmem:[%s1170_s29] sm:$0xf] (%p120_p3)  ;;  %v225_v1 = vld [vmem:[%s1170_s29 + $0x10] sm:$0xf] (%p120_p3) }
  0x10   : > { %224 = vst [vmem:[%s204_s30] sm:$0xf] (%p120_p3), %v223_v0  ;;  %v227_v2 = vld [vmem:[%s1170_s29 + $0x20] sm:$0xf] (%p120_p3)  ;;  %v229_v3 = vld [vmem:[%s1170_s29 + $0x30] sm:$0xf] (%p120_p3) }
  0x11   : > { %226 = vst [vmem:[%s204_s30 + $0x4] sm:$0xf] %v225_v1  ;;  %v231_v4 = vld [vmem:[%s1170_s29 + $0x40] sm:$0xf]  ;;  %v233_v5 = vld [vmem:[%s1170_s29 + $0x50] sm:$0xf] }
  0x12   : > { %228 = vst [vmem:[%s204_s30 + $0x8] sm:$0xf] %v227_v2  ;;  %v235_v6 = vld [vmem:[%s1170_s29 + $0x60] sm:$0xf]  ;;  %v237_v7 = vld [vmem:[%s1170_s29 + $0x70] sm:$0xf] }
  0x13   : > { %230 = vst [vmem:[%s204_s30 + $0xc] sm:$0xf] %v229_v3  ;;  %v239_v8 = vld [vmem:[%s1170_s29 + $0x80] sm:$0xf]  ;;  %v241_v9 = vld [vmem:[%s1170_s29 + $0x90] sm:$0xf] }
  0x14   : > { %232 = vst [vmem:[%s204_s30 + $0x10] sm:$0xf] %v231_v4  ;;  %v243_v10 = vld [vmem:[%s1170_s29 + $0xa0] sm:$0xf]  ;;  %v245_v11 = vld [vmem:[%s1170_s29 + $0xb0] sm:$0xf] }
  0x15   : > { %234 = vst [vmem:[%s204_s30 + $0x14] sm:$0xf] %v233_v5  ;;  %v247_v12 = vld [vmem:[%s1170_s29 + $0xc0] sm:$0xf]  ;;  %v249_v13 = vld [vmem:[%s1170_s29 + $0xd0] sm:$0xf] }
  0x16   : > { %236 = vst [vmem:[%s204_s30 + $0x18] sm:$0xf] %v235_v6  ;;  %v251_v14 = vld [vmem:[%s1170_s29 + $0xe0] sm:$0xf]  ;;  %v253_v15 = vld [vmem:[%s1170_s29 + $0xf0] sm:$0xf] }
  0x17   : > { %238 = vst [vmem:[%s204_s30 + $0x1c] sm:$0xf] %v237_v7 }
  0x18   : > { %240 = vst [vmem:[%s204_s30 + $0x20] sm:$0xf] %v239_v8 }
  0x19   : > { %242 = vst [vmem:[%s204_s30 + $0x24] sm:$0xf] %v241_v9 }
  0x1a   : > { %244 = vst [vmem:[%s204_s30 + $0x28] sm:$0xf] %v243_v10 }
  0x1b   : > { %246 = vst [vmem:[%s204_s30 + $0x2c] sm:$0xf] %v245_v11 }
  0x1c   : > { %248 = vst [vmem:[%s204_s30 + $0x30] sm:$0xf] %v247_v12 }
  0x1d   : > { %250 = vst [vmem:[%s204_s30 + $0x34] sm:$0xf] %v249_v13 }
  0x1e   : > { %252 = vst [vmem:[%s204_s30 + $0x38] sm:$0xf] %v251_v14 }
  0x1f   : > { %254 = vst [vmem:[%s204_s30 + $0x3c] sm:$0xf] %v253_v15 }
  0x20 PF: > { %p896_p6 = scmp.ge.s32.totalorder %s1095_s19, 1  ;;  %p309_p7 = scmp.lt.s32.totalorder %s1095_s19, 5 }
  0x22   : > { %p310_p8 = pnand %p896_p6, %p309_p7 }
  0x23   : > { %s316_s5 = sand.u32 (!%p310_p8), 1, %s1079_s15   ;;  %p898_p9 = scmp.ne.s32.totalorder (!%p310_p8), %s1087_s17, 0 }
  0x24   : > { %313 = sbr.rel (%p310_p8) target bundleno = 1120 (0x460), region = 73  ;;  %s897_s6 = sshll.u32 (!%p310_p8), %s316_s5, 6 }
  0x25   : > { %s1191_s7 = scalar_lea.vmem (!%p310_p8), [#allocation5], %s897_s6 }
  0x29   : > { %383 = sbr.rel (%p898_p9) target bundleno = 59 (0x3b), region = 81 }
  0x2e   : > { %vm384_vm0 = vcmask 7168   ;;  %v1097_v16 = vmov -inf   ;;  %v1098_v17 = vmov 0.0  }
  0x2f   : > { %385 = vst.msk [vmem:[#allocation2] sm:$0xff] %vm384_vm0, %v1097_v16 }
  0x30   : > { %386 = vst.msk [vmem:[#allocation2 + $0x8] sm:$0xff] %vm384_vm0, %v1097_v16 }
  0x31   : > { %387 = vst.msk [vmem:[#allocation2 + $0x10] sm:$0xff] %vm384_vm0, %v1097_v16 }
  0x32   : > { %388 = vst.msk [vmem:[#allocation2 + $0x18] sm:$0xff] %vm384_vm0, %v1097_v16 }
  0x33   : > { %389 = vst.msk [vmem:[#allocation3] sm:$0xff] %vm384_vm0, %v1098_v17 }
  0x34   : > { %390 = vst.msk [vmem:[#allocation3 + $0x8] sm:$0xff] %vm384_vm0, %v1098_v17 }
  0x35   : > { %391 = vst.msk [vmem:[#allocation3 + $0x10] sm:$0xff] %vm384_vm0, %v1098_v17 }
  0x36   : > { %392 = vst.msk [vmem:[#allocation3 + $0x18] sm:$0xff] %vm384_vm0, %v1098_v17 }
  0x37   : > { %393 = vst.msk [vmem:[#allocation4] sm:$0xff] %vm384_vm0, %v1098_v17 }
  0x38   : > { %394 = vst.msk [vmem:[#allocation4 + $0x8] sm:$0xff] %vm384_vm0, %v1098_v17 }
  0x39   : > { %395 = vst.msk [vmem:[#allocation4 + $0x10] sm:$0xff] %vm384_vm0, %v1098_v17 }
  0x3a   : > { %396 = vst.msk [vmem:[#allocation4 + $0x18] sm:$0xff] %vm384_vm0, %v1098_v17 }
  0x3b PF: > { %v955_v18 = vld [vmem:[%s1191_s7 + $0x38] sm:$0xff]  ;;  %v954_v19 = vld [vmem:[%s1191_s7 + $0x30] sm:$0xff]  ;;  %v1099_v20 = vmov 0   ;;  %v501_v22 = vld [vmem:[%s1325_s0] sm:$0xff]  ;;  %v497_v33 = vlaneseq  ;;  %s939_s26 = sshll.u32 %s1087_s17, 7  ;;  %vm541_vm5 = vcmask 7168  }
  0x3c   : > { %477 = vmatpush.bf16.msra.mxu0 %v955_v18  ;;  %956 = vmatpush.bf16.msra.mxu1 %v955_v18  ;;  %v503_v21 = vld [vmem:[%s1325_s0 + $0x10] sm:$0xff]  ;;  %v953_v23 = vld [vmem:[%s1191_s7 + $0x28] sm:$0xff]  ;;  %v504_v24 = vld [vmem:[%s1325_s0 + $0x18] sm:$0xff]  ;;  %v499_v35 = vstv %s939_s26  ;;  %p940_p10 = scmp.eq.s32.totalorder %s1087_s17, 3 }
  0x3d   : > { %1010 = vset.pattern.permute.xlu1 %v1099_v20  ;;  %1009 = vset.pattern.permute.xlu0 %v1099_v20  ;;  %v502_v25 = vld [vmem:[%s1325_s0 + $0x8] sm:$0xff]  ;;  %v952_v26 = vld [vmem:[%s1191_s7 + $0x20] sm:$0xff]  ;;  %v951_v27 = vld [vmem:[%s1191_s7 + $0x18] sm:$0xff]  ;;  %v498_v34 = vand.u32 127, %v497_v33 }
  0x3e   : > { %516 = vperm.xlu1 %1010, %v503_v21   ;;  %510 = vperm.xlu0 %1009, %v501_v22   ;;  %v950_v28 = vld [vmem:[%s1191_s7 + $0x10] sm:$0xff]  ;;  %v949_v29 = vld [vmem:[%s1191_s7 + $0x8] sm:$0xff]  ;;  %v948_v30 = vld [vmem:[%s1191_s7] sm:$0xff] }
  0x3f   : > { %v946_v31 = vld [vmem:[%s1327_s2] sm:$0xff]  ;;  %v947_v32 = vld [vmem:[%s1327_s2 + $0x8] sm:$0xff]  ;;  %v1221_v36 = vadd.s32 %v499_v35, %v498_v34 }
  0x40   : > { %478 = vmatpush.bf16.msra.mxu0 %v954_v19  ;;  %957 = vmatpush.bf16.msra.mxu1 %v954_v19  ;;  %v507_v49 = vld [vmem:[#allocation4 + $0x10] sm:$0xff]  ;;  %v505_v50 = vld [vmem:[#allocation4] sm:$0xff]  ;;  %v506_v56 = vld [vmem:[#allocation4 + $0x8] sm:$0xff] }
  0x41   : > { %v508_v55 = vld [vmem:[#allocation4 + $0x18] sm:$0xff] }
  0x44   : > { %479 = vmatpush.bf16.msra.mxu0 %v953_v23  ;;  %958 = vmatpush.bf16.msra.mxu1 %v953_v23 }
  0x46   : > { %519 = vperm.xlu1 %1010, %v504_v24   ;;  %513 = vperm.xlu0 %1009, %v502_v25  }
  0x48   : > { %480 = vmatpush.bf16.msra.mxu0 %v952_v26  ;;  %959 = vmatpush.bf16.msra.mxu1 %v952_v26 }
  0x4c   : > { %481 = vmatpush.bf16.msra.mxu0 %v951_v27  ;;  %960 = vmatpush.bf16.msra.mxu1 %v951_v27 }
  0x50   : > { %482 = vmatpush.bf16.msra.mxu0 %v950_v28  ;;  %961 = vmatpush.bf16.msra.mxu1 %v950_v28 }
  0x54   : > { %483 = vmatpush.bf16.msra.mxu0 %v949_v29  ;;  %962 = vmatpush.bf16.msra.mxu1 %v949_v29 }
  0x58   : > { %484 = vmatpush.bf16.msra.mxu0 %v948_v30  ;;  %963 = vmatpush.bf16.msra.mxu1 %v948_v30 }
  0x5b   : > { %485 = vmatmul.bf16.vlgmr.msra.gmra.mxu0 %v946_v31  ;;  %490 = vmatmul.bf16.vlgmr.msra.gmra.mxu1 %v947_v32 }
  0xb0   : > { %v517_v37 = vpop.permute.xlu1 %516  ;;  %v511_v38 = vpop.permute.xlu0 %510 }
  0xb1   : > { %vm523_vm1 = vcmp.eq.s32.totalorder %v1221_v36, %v517_v37  ;;  %vm521_vm2 = vcmp.eq.s32.totalorder %v1221_v36, %v511_v38 }
  0xb8   : > { %v520_v43 = vpop.permute.xlu1 %519  ;;  %v514_v44 = vpop.permute.xlu0 %513 }
  0xb9   : > { %vm524_vm3 = vcmp.eq.s32.totalorder %v1221_v36, %v520_v43  ;;  %vm522_vm4 = vcmp.eq.s32.totalorder %v1221_v36, %v514_v44 }
  0xd8   : > { %v1225_v39 = vpop.f32.mrf.mxu0  ;;  %v1227_v40 = vpop.f32.mrf.mxu1 }
  0xd9   : > { %v527_v41 = vsel %vm523_vm1, %v1227_v40, 0.0  ;;  %v525_v42 = vsel %vm521_vm2, %v1225_v39, 0.0 }
  0xda   : > { %533 = vadd.xlane.f32.xlu0 %v527_v41  ;;  %529 = vadd.xlane.f32.xlu2 %v525_v42 }
  0xe0   : > { %v1233_v45 = vpop.f32.mrf.mxu0  ;;  %v1235_v46 = vpop.f32.mrf.mxu1 }
  0xe1   : > { %v528_v47 = vsel %vm524_vm3, %v1235_v46, 0.0  ;;  %v526_v48 = vsel %vm522_vm4, %v1233_v45, 0.0 }
  0xe2   : > { %535 = vadd.xlane.f32.xlu1 %v528_v47  ;;  %531 = vadd.xlane.f32.xlu2 %v526_v48 }
 0x14d   : > { %v534_v51 = vpop.xlane.xlu0 %533  ;;  %v530_v52 = vpop.xlane.xlu2 %529 }
 0x14e   : > { %v539_v53 = vadd.f32 %v534_v51, %v507_v49  ;;  %v537_v54 = vadd.f32 %v530_v52, %v505_v50 }
 0x150   : > { %544 = vst.msk [vmem:[#allocation4 + $0x10] sm:$0xff] %vm541_vm5, %v539_v53 }
 0x151   : > { %542 = vst.msk [vmem:[#allocation4] sm:$0xff] %vm541_vm5, %v537_v54 }
 0x155   : > { %v536_v57 = vpop.xlane.xlu1 %535  ;;  %v532_v58 = vpop.xlane.xlu2 %531  ;;  %549 = sbr.rel (%p940_p10) target bundleno = 717 (0x2cd), region = 85 }
 0x156   : > { %v540_v59 = vadd.f32 %v536_v57, %v508_v55  ;;  %v538_v60 = vadd.f32 %v532_v58, %v506_v56 }
 0x158   : > { %545 = vst.msk [vmem:[#allocation4 + $0x18] sm:$0xff] %vm541_vm5, %v540_v59 }
 0x159   : > { %543 = vst.msk [vmem:[#allocation4 + $0x8] sm:$0xff] %vm541_vm5, %v538_v60 }
 0x15a   : > { %558 = vmax.xlane.f32.xlu1 %v1227_v40  ;;  %554 = vmax.xlane.f32.xlu0 %v1225_v39  ;;  %v1100_v61 = vmov 0   ;;  %v1248_v62 = vld [vmem:[#allocation2 + $0x10] sm:$0xff]  ;;  %v550_v63 = vld [vmem:[#allocation2] sm:$0xff]  ;;  %v553_v6 = vld [vmem:[#allocation2 + $0x18] sm:$0xff] }
 0x15b   : > { %1012 = vset.pattern.permute.xlu0 %v1100_v61  ;;  %1011 = vset.pattern.permute.xlu2 %v1100_v61  ;;  %v551_v7 = vld [vmem:[#allocation2 + $0x8] sm:$0xff]  ;;  %v578_v33 = vld [vmem:[#allocation3] sm:$0xff]  ;;  %v580_v50 = vld [vmem:[#allocation3 + $0x10] sm:$0xff] }
 0x15c   : > { %1013 = vset.pattern.permute.xlu1 %v1100_v61  ;;  %v579_v41 = vld [vmem:[#allocation3 + $0x8] sm:$0xff]  ;;  %v581_v55 = vld [vmem:[#allocation3 + $0x18] sm:$0xff] }
 0x162   : > { %560 = vmax.xlane.f32.xlu1 %v1235_v46  ;;  %556 = vmax.xlane.f32.xlu0 %v1233_v45 }
 0x1cd   : > { %v559_v0 = vpop.xlane.xlu1 %558  ;;  %v555_v1 = vpop.xlane.xlu0 %554 }
 0x1ce   : > { %v564_v2 = vmax.f32 %v1248_v62, %v559_v0  ;;  %v562_v3 = vmax.f32 %v550_v63, %v555_v1 }
 0x1d0   : > { %v568_v4 = vsub.f32 %v1248_v62, %v564_v2  ;;  %636 = vst.msk [vmem:[#allocation2 + $0x10] sm:$0xff] %vm541_vm5, %v564_v2  ;;  %v566_v5 = vsub.f32 %v550_v63, %v562_v3  ;;  %598 = vperm.xlu0 %1012, %v564_v2   ;;  %588 = vperm.xlu2 %1011, %v562_v3  }
 0x1d1   : > { %634 = vst.msk [vmem:[#allocation2] sm:$0xff] %vm541_vm5, %v562_v3 }
 0x1d2   : > { %v570_v30 = vmul.f32 1.442695, %v566_v5  ;;  %v574_v47 = vmul.f32 1.442695, %v568_v4 }
 0x1d5   : > { %v561_v8 = vpop.xlane.xlu1 %560  ;;  %v557_v9 = vpop.xlane.xlu0 %556 }
 0x1d6   : > { %v565_v10 = vmax.f32 %v553_v6, %v561_v8  ;;  %v563_v11 = vmax.f32 %v551_v7, %v557_v9 }
 0x1d8   : > { %v569_v12 = vsub.f32 %v553_v6, %v565_v10  ;;  %637 = vst.msk [vmem:[#allocation2 + $0x18] sm:$0xff] %vm541_vm5, %v565_v10  ;;  %v567_v13 = vsub.f32 %v551_v7, %v563_v11  ;;  %603 = vperm.xlu1 %1013, %v565_v10   ;;  %593 = vperm.xlu2 %1011, %v563_v11  }
 0x1d9   : > { %635 = vst.msk [vmem:[#allocation2 + $0x8] sm:$0xff] %vm541_vm5, %v563_v11 }
 0x1da   : > { %v572_v31 = vmul.f32 1.442695, %v567_v13  ;;  %v576_v48 = vmul.f32 1.442695, %v569_v12 }
 0x22a   : > { %v589_v14 = vpop.permute.xlu2 %588 }
 0x22b   : > { %v606_v15 = vsub.f32 %v1225_v39, %v589_v14 }
 0x22d   : > { %v610_v16 = vmul.f32 1.442695, %v606_v15 }
 0x22f   : > { %1014 = vpow2.f32 %v610_v16 }
 0x232   : > { %v594_v17 = vpop.permute.xlu2 %593 }
 0x233   : > { %v607_v18 = vsub.f32 %v1233_v45, %v594_v17 }
 0x235   : > { %v1015_v19 = vpop.eup %1014  ;;  %v612_v20 = vmul.f32 1.442695, %v607_v18 }
 0x236   : > { %618 = vadd.xlane.f32.xlu2 %v1015_v19 }
 0x237   : > { %1016 = vpow2.f32 %v612_v20 }
 0x23d   : > { %v1017_v21 = vpop.eup %1016 }
 0x23e   : > { %620 = vadd.xlane.f32.xlu1 %v1017_v21 }
 0x242   : > { %v599_v22 = vpop.permute.xlu0 %598 }
 0x243   : > { %v608_v23 = vsub.f32 %v1227_v40, %v599_v22 }
 0x245   : > { %v614_v24 = vmul.f32 1.442695, %v608_v23 }
 0x247   : > { %1018 = vpow2.f32 %v614_v24 }
 0x24a   : > { %v604_v25 = vpop.permute.xlu1 %603 }
 0x24b   : > { %v609_v26 = vsub.f32 %v1235_v46, %v604_v25 }
 0x24d   : > { %v1019_v27 = vpop.eup %1018  ;;  %v616_v28 = vmul.f32 1.442695, %v609_v26 }
 0x24e   : > { %622 = vadd.xlane.f32.xlu0 %v1019_v27 }
 0x24f   : > { %1020 = vpow2.f32 %v616_v28 }
 0x250   : > { %1022 = vpow2.f32 %v570_v30 }
 0x251   : > { %1024 = vpow2.f32 %v572_v31 }
 0x252   : > { %1026 = vpow2.f32 %v574_v47 }
 0x253   : > { %1028 = vpow2.f32 %v576_v48 }
 0x255   : > { %v1021_v29 = vpop.eup %1020 }
 0x256   : > { %624 = vadd.xlane.f32.xlu2 %v1021_v29  ;;  %v1023_v32 = vpop.eup %1022 }
 0x257   : > { %v582_v34 = vmul.f32 %v1023_v32, %v578_v33  ;;  %v1025_v38 = vpop.eup %1024 }
 0x258   : > { %v583_v42 = vmul.f32 %v1025_v38, %v579_v41  ;;  %v1027_v49 = vpop.eup %1026 }
 0x259   : > { %v584_v51 = vmul.f32 %v1027_v49, %v580_v50  ;;  %v1029_v54 = vpop.eup %1028 }
 0x25a   : > { %v585_v56 = vmul.f32 %v1029_v54, %v581_v55 }
 0x2a9   : > { %v619_v35 = vpop.xlane.xlu2 %618 }
 0x2aa   : > { %v626_v37 = vadd.f32 %v619_v35, %v582_v34 }
 0x2ac   : > { %630 = vst.msk [vmem:[#allocation3] sm:$0xff] %vm541_vm5, %v626_v37 }
 0x2b1   : > { %v621_v43 = vpop.xlane.xlu1 %620 }
 0x2b2   : > { %v627_v44 = vadd.f32 %v621_v43, %v583_v42 }
 0x2b4   : > { %631 = vst.msk [vmem:[#allocation3 + $0x8] sm:$0xff] %vm541_vm5, %v627_v44 }
 0x2c1   : > { %v623_v52 = vpop.xlane.xlu0 %622 }
 0x2c2   : > { %v628_v53 = vadd.f32 %v623_v52, %v584_v51 }
 0x2c4   : > { %632 = vst.msk [vmem:[#allocation3 + $0x10] sm:$0xff] %vm541_vm5, %v628_v53 }
 0x2c9   : > { %v625_v57 = vpop.xlane.xlu2 %624 }
 0x2ca   : > { %v629_v58 = vadd.f32 %v625_v57, %v585_v56 }
 0x2cc   : > { %633 = vst.msk [vmem:[#allocation3 + $0x18] sm:$0xff] %vm541_vm5, %v629_v58 }
 0x2cd PF: > { %p941_p11 = scmp.ne.s32.totalorder %s1087_s17, 3 }
 0x2cf   : > { %641 = sbr.rel (%p941_p11) target bundleno = 1120 (0x460), region = 89 }
 0x2d4   : > { %vm642_vm6 = vcmp.lt.s32.totalorder %v1221_v36, 448  ;;  %v1101_v63 = vmov 0   ;;  %v1270_v0 = vld [vmem:[#allocation2 + $0x10] sm:$0xff]  ;;  %v647_v1 = vld [vmem:[#allocation2] sm:$0xff]  ;;  %v648_v4 = vld [vmem:[#allocation2 + $0x8] sm:$0xff] }
 0x2d5   : > { %v645_v59 = vsel %vm642_vm6, %v1227_v40, -1e+30  ;;  %v643_v60 = vsel %vm642_vm6, %v1225_v39, -1e+30  ;;  %v646_v61 = vsel %vm642_vm6, %v1235_v46, -1e+30  ;;  %1031 = vset.pattern.permute.xlu0 %v1101_v63  ;;  %1030 = vset.pattern.permute.xlu2 %v1101_v63 }
 0x2d6   : > { %655 = vmax.xlane.f32.xlu1 %v645_v59  ;;  %651 = vmax.xlane.f32.xlu0 %v643_v60  ;;  %v644_v62 = vsel %vm642_vm6, %v1233_v45, -1e+30  ;;  %v650_v45 = vld [vmem:[#allocation2 + $0x18] sm:$0xff]  ;;  %v675_v30 = vld [vmem:[#allocation3] sm:$0xff]  ;;  %v676_v35 = vld [vmem:[#allocation3 + $0x8] sm:$0xff] }
 0x2d7   : > { %1032 = vset.pattern.permute.xlu1 %v1101_v63  ;;  %v735_v51 = vld [vmem:[#allocation4] sm:$0xff]  ;;  %v677_v54 = vld [vmem:[#allocation3 + $0x10] sm:$0xff] }
 0x2d8   : > { %v763_v55 = vld [vmem:[%s1326_s1] sm:$0xff] }
 0x2de   : > { %657 = vmax.xlane.f32.xlu1 %v646_v61  ;;  %653 = vmax.xlane.f32.xlu0 %v644_v62 }
 0x349   : > { %v656_v36 = vpop.xlane.xlu1 %655  ;;  %v652_v2 = vpop.xlane.xlu0 %651 }
 0x34a   : > { %v661_v40 = vmax.f32 %v1270_v0, %v656_v36  ;;  %v659_v39 = vmax.f32 %v647_v1, %v652_v2  ;;  %v678_v2 = vld [vmem:[#allocation3 + $0x18] sm:$0xff] }
 0x34c   : > { %v665_v3 = vsub.f32 %v1270_v0, %v661_v40  ;;  %733 = vst.msk [vmem:[#allocation2 + $0x10] sm:$0xff] %vm541_vm5, %v661_v40  ;;  %v663_v46 = vsub.f32 %v647_v1, %v659_v39  ;;  %695 = vperm.xlu0 %1031, %v661_v40   ;;  %685 = vperm.xlu2 %1030, %v659_v39   ;;  %v736_v0 = vld [vmem:[#allocation4 + $0x8] sm:$0xff] }
 0x34d   : > { %731 = vst.msk [vmem:[#allocation2] sm:$0xff] %vm541_vm5, %v659_v39  ;;  %v764_v40 = vld [vmem:[%s1326_s1 + $0x8] sm:$0xff] }
 0x34e   : > { %v667_v27 = vmul.f32 1.442695, %v663_v46  ;;  %v671_v42 = vmul.f32 1.442695, %v665_v3 }
 0x351   : > { %v658_v5 = vpop.xlane.xlu1 %657  ;;  %v654_v6 = vpop.xlane.xlu0 %653 }
 0x352   : > { %v662_v7 = vmax.f32 %v650_v45, %v658_v5  ;;  %v660_v8 = vmax.f32 %v648_v4, %v654_v6 }
 0x354   : > { %v666_v9 = vsub.f32 %v650_v45, %v662_v7  ;;  %734 = vst.msk [vmem:[#allocation2 + $0x18] sm:$0xff] %vm541_vm5, %v662_v7  ;;  %v664_v10 = vsub.f32 %v648_v4, %v660_v8  ;;  %700 = vperm.xlu1 %1032, %v662_v7   ;;  %690 = vperm.xlu2 %1030, %v660_v8   ;;  %v739_v50 = vld [vmem:[#allocation2] sm:$0xff] }
 0x355   : > { %732 = vst.msk [vmem:[#allocation2 + $0x8] sm:$0xff] %vm541_vm5, %v660_v8 }
 0x356   : > { %v669_v28 = vmul.f32 1.442695, %v664_v10  ;;  %v673_v47 = vmul.f32 1.442695, %v666_v9  ;;  %v741_v9 = vld [vmem:[#allocation2 + $0x10] sm:$0xff] }
 0x357   : > { %v737_v10 = vld [vmem:[#allocation4 + $0x10] sm:$0xff] }
 0x35c   : > { %v740_v63 = vld [vmem:[#allocation2 + $0x8] sm:$0xff] }
 0x3a6   : > { %v686_v11 = vpop.permute.xlu2 %685 }
 0x3a7   : > { %v703_v12 = vsub.f32 %v643_v60, %v686_v11 }
 0x3a9   : > { %v707_v13 = vmul.f32 1.442695, %v703_v12  ;;  %v765_v12 = vld [vmem:[%s1326_s1 + $0x10] sm:$0xff] }
 0x3ab   : > { %1033 = vpow2.f32 %v707_v13 }
 0x3ae   : > { %v691_v14 = vpop.permute.xlu2 %690 }
 0x3af   : > { %v704_v15 = vsub.f32 %v644_v62, %v691_v14 }
 0x3b1   : > { %v1034_v16 = vpop.eup %1033  ;;  %v709_v17 = vmul.f32 1.442695, %v704_v15 }
 0x3b2   : > { %715 = vadd.xlane.f32.xlu2 %v1034_v16 }
 0x3b3   : > { %1035 = vpow2.f32 %v709_v17  ;;  %v742_v17 = vld [vmem:[#allocation2 + $0x18] sm:$0xff] }
 0x3b9   : > { %v1036_v18 = vpop.eup %1035 }
 0x3ba   : > { %717 = vadd.xlane.f32.xlu1 %v1036_v18  ;;  %v738_v18 = vld [vmem:[#allocation4 + $0x18] sm:$0xff] }
 0x3be   : > { %v696_v19 = vpop.permute.xlu0 %695 }
 0x3bf   : > { %v705_v20 = vsub.f32 %v645_v59, %v696_v19 }
 0x3c1   : > { %v711_v21 = vmul.f32 1.442695, %v705_v20  ;;  %v766_v20 = vld [vmem:[%s1326_s1 + $0x18] sm:$0xff] }
 0x3c3   : > { %1037 = vpow2.f32 %v711_v21 }
 0x3c6   : > { %v701_v22 = vpop.permute.xlu1 %700 }
 0x3c7   : > { %v706_v23 = vsub.f32 %v646_v61, %v701_v22 }
 0x3c9   : > { %v1038_v24 = vpop.eup %1037  ;;  %v713_v25 = vmul.f32 1.442695, %v706_v23 }
 0x3ca   : > { %719 = vadd.xlane.f32.xlu0 %v1038_v24 }
 0x3cb   : > { %1039 = vpow2.f32 %v713_v25 }
 0x3cc   : > { %1041 = vpow2.f32 %v667_v27 }
 0x3cd   : > { %1043 = vpow2.f32 %v669_v28 }
 0x3d1   : > { %v1040_v26 = vpop.eup %1039 }
 0x3d2   : > { %721 = vadd.xlane.f32.xlu2 %v1040_v26  ;;  %v1042_v29 = vpop.eup %1041 }
 0x3d3   : > { %v679_v31 = vmul.f32 %v1042_v29, %v675_v30  ;;  %v1044_v34 = vpop.eup %1043 }
 0x3d4   : > { %v680_v37 = vmul.f32 %v1044_v34, %v676_v35 }
 0x425   : > { %v716_v32 = vpop.xlane.xlu2 %715 }
 0x426   : > { %v723_v33 = vadd.f32 %v716_v32, %v679_v31 }
 0x428   : > { %727 = vst.msk [vmem:[#allocation3] sm:$0xff] %vm541_vm5, %v723_v33 }
 0x42d   : > { %v718_v38 = vpop.xlane.xlu1 %717 }
 0x42e   : > { %v724_v41 = vadd.f32 %v718_v38, %v680_v37 }
 0x42f   : > { %v743_v43 = vld [vmem:[#allocation3] sm:$0xff] }
 0x430   : > { %1045 = vlog2.f32 %v743_v43  ;;  %728 = vst.msk [vmem:[#allocation3 + $0x8] sm:$0xff] %vm541_vm5, %v724_v41 }
 0x431   : > { %1047 = vpow2.f32 %v671_v42 }
 0x436   : > { %v1046_v44 = vpop.eup %1045 }
 0x437   : > { %v748_v48 = vmul.f32 0.6931472, %v1046_v44  ;;  %v744_v49 = vld [vmem:[#allocation3 + $0x8] sm:$0xff]  ;;  %v1048_v52 = vpop.eup %1047 }
 0x438   : > { %1049 = vlog2.f32 %v744_v49  ;;  %v681_v57 = vmul.f32 %v1048_v52, %v677_v54 }
 0x439   : > { %v755_v53 = vadd.f32 %v748_v48, %v739_v50  ;;  %1051 = vpow2.f32 %v673_v47 }
 0x43b   : > { %v759_v56 = vsub.f32 %v735_v51, %v755_v53 }
 0x43d   : > { %v767_v58 = vmul.f32 %v763_v55, %v759_v56  ;;  %v720_v59 = vpop.xlane.xlu0 %719 }
 0x43e   : > { %v1050_v60 = vpop.eup %1049  ;;  %v725_v61 = vadd.f32 %v720_v59, %v681_v57 }
 0x43f   : > { %771 = vst.msk [vmem:[%s1329_s4] sm:$0xff] %vm541_vm5, %v767_v58  ;;  %v750_v62 = vmul.f32 0.6931472, %v1050_v60  ;;  %v1052_v1 = vpop.eup %1051 }
 0x440   : > { %729 = vst.msk [vmem:[#allocation3 + $0x10] sm:$0xff] %vm541_vm5, %v725_v61  ;;  %v682_v3 = vmul.f32 %v1052_v1, %v678_v2 }
 0x441   : > { %v756_v36 = vadd.f32 %v750_v62, %v740_v63 }
 0x443   : > { %v760_v39 = vsub.f32 %v736_v0, %v756_v36 }
 0x445   : > { %v768_v46 = vmul.f32 %v764_v40, %v760_v39  ;;  %v722_v45 = vpop.xlane.xlu2 %721 }
 0x446   : > { %v726_v4 = vadd.f32 %v722_v45, %v682_v3 }
 0x447   : > { %772 = vst.msk [vmem:[%s1329_s4 + $0x8] sm:$0xff] %vm541_vm5, %v768_v46  ;;  %v745_v5 = vld [vmem:[#allocation3 + $0x10] sm:$0xff] }
 0x448   : > { %1053 = vlog2.f32 %v745_v5  ;;  %730 = vst.msk [vmem:[#allocation3 + $0x18] sm:$0xff] %vm541_vm5, %v726_v4 }
 0x44e   : > { %v1054_v6 = vpop.eup %1053 }
 0x44f   : > { %v752_v7 = vmul.f32 0.6931472, %v1054_v6  ;;  %v746_v8 = vld [vmem:[#allocation3 + $0x18] sm:$0xff] }
 0x450   : > { %1055 = vlog2.f32 %v746_v8 }
 0x451   : > { %v757_v11 = vadd.f32 %v752_v7, %v741_v9 }
 0x453   : > { %v761_v13 = vsub.f32 %v737_v10, %v757_v11 }
 0x455   : > { %v769_v14 = vmul.f32 %v765_v12, %v761_v13 }
 0x456   : > { %v1056_v15 = vpop.eup %1055 }
 0x457   : > { %773 = vst.msk [vmem:[%s1329_s4 + $0x10] sm:$0xff] %vm541_vm5, %v769_v14  ;;  %v754_v16 = vmul.f32 0.6931472, %v1056_v15 }
 0x459   : > { %v758_v19 = vadd.f32 %v754_v16, %v742_v17 }
 0x45b   : > { %v762_v21 = vsub.f32 %v738_v18, %v758_v19 }
 0x45d   : > { %v770_v22 = vmul.f32 %v766_v20, %v762_v21 }
 0x45f   : > { %774 = vst.msk [vmem:[%s1329_s4 + $0x18] sm:$0xff] %vm541_vm5, %v770_v22 }
 0x460 PF: > { %s14_s19 = sadd.s32 1, %s1095_s19   ;;  %s1330_s15 = smov %s1083_s16 }
 0x461   : > { %p11_p12 = scmp.ge.s32.totalorder %s14_s19, 6   ;;  %s1331_s16 = smov %s1162_s23 }
 0x462   : > { %s1332_s17 = smov %s1091_s18  ;;  %s1333_s18 = smov %s1335_s20 }
 0x463   :  { %13 = sbr.rel (!%p11_p12) target bundleno = 3 (0x3), region = 133 }

</bundles_post_ra>
